<compile_context>
chip_gen: v5e
topology: v5e:2x2
jax: 0.10.0
libtpu: 0.0.40
codegen_flags: <defaults>
</compile_context>

<pallas_src>
import functools
import math

import jax
import jax.numpy as jnp
from jax import lax
from jax.experimental import pallas as pl
from jax.experimental.pallas import tpu as pltpu


# ----------------------------- fused TLSTM + attention kernel -----------------------------
def _memenc_kernel(L, xp_ref, t_ref, m_ref, whh_ref, bhh_ref, wcc_ref, bcc_ref,
                   wattn_ref, hs_ref, cs_ref, ctx_ref):
    # xp  (T, B, 4H)  precomputed x @ W_ih + b_ih
    # t   (T, B, 1)   interval
    # m   (T, B, 1)   mask
    # hs/cs outputs (T, B, H); ctx output (B, K, H)
    T, B, H = hs_ref.shape
    K = ctx_ref.shape[1]

    whh = whh_ref[...]        # (H, 4H)
    bhh = bhh_ref[...]        # (1, 4H)
    wcc = wcc_ref[...]        # (H, H)
    bcc = bcc_ref[...]        # (1, H)

    def step_fn(step, carry):
        h, c = carry
        xp = xp_ref[step]                                     # (B, 4H)
        tinv = pl.reciprocal(t_ref[step], approx=True)        # (B, 1)

        # c2cs path
        cs_g = jnp.tanh(jnp.dot(c, wcc, preferred_element_type=jnp.float32) + bcc)
        c_star = (c - cs_g) + cs_g * tinv

        # gate preactivations (x-part precomputed outside the recurrence)
        preact = xp + jnp.dot(h, whh, preferred_element_type=jnp.float32) + bhh
        i_t = jax.nn.sigmoid(preact[:, 0:H])
        f_t = jax.nn.sigmoid(preact[:, H:2 * H])
        o_t = jax.nn.sigmoid(preact[:, 2 * H:3 * H])
        g_t = jnp.tanh(preact[:, 3 * H:4 * H])

        c_t = c_star * f_t + i_t * g_t
        h_t = o_t * jnp.tanh(c_t)

        hs_ref[step] = h_t
        cs_ref[step] = c_t
        return (h_t, c_t)

    h0 = jnp.zeros((B, H), jnp.float32)
    c0 = jnp.zeros((B, H), jnp.float32)
    lax.fori_loop(0, T, step_fn, (h0, c0), unroll=True)

    # ---------------- attention / context (hs stays VMEM-resident) ----------------
    hs_all = hs_ref[...]        # (T, B, H)
    mask = m_ref[...]           # (T, B, 1)
    w = wattn_ref[...]          # (H, K)

    attn_per_b = []
    total = jnp.zeros((1, 1), jnp.float32)
    for b in range(B):                                   # B is small & static
        h_b = hs_all[:, b, :]                            # (T, H)
        logit_b = jnp.dot(h_b, w, preferred_element_type=jnp.float32) * L  # (T, K)
        # softmax over time (PyTorch dim=1)
        m_max = jnp.max(logit_b, axis=0, keepdims=True)
        e = jnp.exp(logit_b - m_max)
        denom_inv = pl.reciprocal(jnp.sum(e, axis=0, keepdims=True), approx=True)
        a_b = e * denom_inv
        a_b = a_b * mask[:, b, :]                        # (T, K) * (T, 1)
        attn_per_b.append(a_b)
        total = total + jnp.sum(a_b)                     # global (all-element) normalizer

    inv_total = pl.reciprocal(total, approx=True)        # (1, 1)
    for b in range(B):
        a_b = attn_per_b[b] * inv_total                  # (T, K)
        # context[b, k, h] = sum_t a_b[t, k] * hs[t, b, h]
        ctx_ref[b] = lax.dot_general(a_b, hs_all[:, b, :],
                                     (((0,), (0,)), ((), ())),
                                     preferred_element_type=jnp.float32)


# ----------------------------- wrapper -----------------------------
@functools.partial(jax.jit, static_argnames=("L",))
def memory_encoder_forward(x, interval, mask, params, L=1):
    """x (B,T,I), interval (B,T,1), mask (B,T) -> hs (B,T,H), (hs, cs), context (B,K,H)."""
    B, T, I = x.shape
    H = params["w_hh"].shape[0]
    K = params["w_attn"].shape[1]

    # Hoist the input projection out of the serial recurrence: one batched matmul.
    xp = (x.reshape(B * T, I).astype(jnp.float32) @ params["w_ih"]
          + params["b_ih"]).reshape(B, T, 4 * H)
    xp_tm = jnp.transpose(xp, (1, 0, 2))                                   # (T, B, 4H)
    t_tm = jnp.transpose(interval, (1, 0, 2)).astype(jnp.float32)          # (T, B, 1)
    m_tm = jnp.transpose(mask, (1, 0))[:, :, None].astype(jnp.float32)     # (T, B, 1)

    flops = int(2 * T * B * (H * 4 * H + H * H) + 4 * B * T * H * K)
    transcendentals = int(T * B * (5 * H + 1) + 2 * B * T * K)
    bytes_accessed = int(4 * (T * B * (4 * H + 2)
                              + H * 4 * H + 4 * H + H * H + H + H * K
                              + 2 * T * B * H + B * K * H))

    hs_tm, cs_tm, context = pl.pallas_call(
        functools.partial(_memenc_kernel, float(L)),
        out_shape=(jax.ShapeDtypeStruct((T, B, H), jnp.float32),
                   jax.ShapeDtypeStruct((T, B, H), jnp.float32),
                   jax.ShapeDtypeStruct((B, K, H), jnp.float32)),
        grid=(1,),
        in_specs=[
            pl.BlockSpec((T, B, 4 * H), lambda i: (0, 0, 0)),
            pl.BlockSpec((T, B, 1), lambda i: (0, 0, 0)),
            pl.BlockSpec((T, B, 1), lambda i: (0, 0, 0)),
            pl.BlockSpec((H, 4 * H), lambda i: (0, 0)),
            pl.BlockSpec((1, 4 * H), lambda i: (0, 0)),
            pl.BlockSpec((H, H), lambda i: (0, 0)),
            pl.BlockSpec((1, H), lambda i: (0, 0)),
            pl.BlockSpec((H, K), lambda i: (0, 0)),
        ],
        out_specs=(
            pl.BlockSpec((T, B, H), lambda i: (0, 0, 0)),
            pl.BlockSpec((T, B, H), lambda i: (0, 0, 0)),
            pl.BlockSpec((B, K, H), lambda i: (0, 0, 0)),
        ),
        compiler_params=pltpu.CompilerParams(dimension_semantics=("arbitrary",)),
        cost_estimate=pl.CostEstimate(flops=flops,
                                      transcendentals=transcendentals,
                                      bytes_accessed=bytes_accessed),
    )(xp_tm, t_tm, m_tm, params["w_hh"], params["b_hh"],
      params["w_cc"], params["b_cc"], params["w_attn"])

    hs = jnp.transpose(hs_tm, (1, 0, 2))   # (B, T, H)
    cs = jnp.transpose(cs_tm, (1, 0, 2))   # (B, T, H)
    return hs, (hs, cs), context


# ----------------------------- deterministic parameter init -----------------------------
def init_params(key, input_size, hidden_size, K):
    std = 1.0 / math.sqrt(hidden_size)
    ks = jax.random.split(key, 7)

    def u(k, shape):
        return jax.random.uniform(k, shape, jnp.float32, -std, std)

    # Linear weights stored transposed: (in_features, out_features) so y = x @ W + b.
    return {
        "w_ih": u(ks[0], (input_size, 4 * hidden_size)),
        "b_ih": u(ks[1], (1, 4 * hidden_size)),
        "w_hh": u(ks[2], (hidden_size, 4 * hidden_size)),
        "b_hh": u(ks[3], (1, 4 * hidden_size)),
        "w_cc": u(ks[4], (hidden_size, hidden_size)),
        "b_cc": u(ks[5], (1, hidden_size)),
        "w_attn": u(ks[6], (hidden_size, K)),   # attn Linear, bias=False
    }


# ----------------------------- pure-JAX reference (for checking) -----------------------------
def reference_forward(x, interval, mask, params, L=1):
    B, T, I = x.shape
    H = params["w_hh"].shape[0]
    h = jnp.zeros((B, H), jnp.float32)
    c = jnp.zeros((B, H), jnp.float32)
    hs_l, cs_l = [], []
    for i in range(T):
        xi = x[:, i, :]
        ti = interval[:, i, :]
        cs_g = jnp.tanh(c @ params["w_cc"] + params["b_cc"])
        c_star = (c - cs_g) + cs_g / ti
        preact = (xi @ params["w_ih"] + params["b_ih"]
                  + h @ params["w_hh"] + params["b_hh"])
        i_t = jax.nn.sigmoid(preact[:, :H])
        f_t = jax.nn.sigmoid(preact[:, H:2 * H])
        o_t = jax.nn.sigmoid(preact[:, 2 * H:3 * H])
        g_t = jnp.tanh(preact[:, 3 * H:])
        c = c_star * f_t + i_t * g_t
        h = o_t * jnp.tanh(c)
        hs_l.append(h)
        cs_l.append(c)
    hs = jnp.stack(hs_l, axis=1)
    cs = jnp.stack(cs_l, axis=1)
    attn = (hs @ params["w_attn"]) * L
    attn = jax.nn.softmax(attn, axis=1) * mask[:, :, None]
    attn = attn / jnp.sum(attn)
    context = jnp.einsum("btk,bth->bkh", attn, hs)
    return hs, (hs, cs), context


if __name__ == "__main__":
    B, T, I, H, K, L = 2, 8, 8, 32, 4, 1
    key = jax.random.PRNGKey(0)
    kp, kx, kt, km = jax.random.split(key, 4)

    params = init_params(kp, I, H, K)
    x = jax.random.normal(kx, (B, T, I), jnp.float32)
    interval = jax.random.uniform(kt, (B, T, 1), jnp.float32, 0.5, 2.0)
    mask = (jax.random.uniform(km, (B, T)) > 0.2).astype(jnp.float32)
    mask = mask.at[:, 0].set(1.0)   # ensure nonzero global normalizer

    hs, (hs2, cs), ctx = memory_encoder_forward(x, interval, mask, params, L=L)
    jax.block_until_ready((hs, cs, ctx))

    hs_r, (_, cs_r), ctx_r = reference_forward(x, interval, mask, params, L=L)
    assert hs.shape == (B, T, H) and cs.shape == (B, T, H) and ctx.shape == (B, K, H)
    assert jnp.allclose(hs, hs_r, rtol=2e-2, atol=2e-2)
    assert jnp.allclose(cs, cs_r, rtol=2e-2, atol=2e-2)
    assert jnp.allclose(ctx, ctx_r, rtol=2e-2, atol=2e-2)
    print("KERNEL_OK")
</pallas_src>

<mosaic_0001>
module attributes {stable_mosaic.version = 11 : i64} {
  func.func @_memenc_kernel(%arg0: i32, %arg1: memref<8x2x128xf32, #tpu.memory_space<vmem>>, %arg2: memref<8x2x1xf32, #tpu.memory_space<vmem>>, %arg3: memref<8x2x1xf32, #tpu.memory_space<vmem>>, %arg4: memref<32x128xf32, #tpu.memory_space<vmem>>, %arg5: memref<1x128xf32, #tpu.memory_space<vmem>>, %arg6: memref<32x32xf32, #tpu.memory_space<vmem>>, %arg7: memref<1x32xf32, #tpu.memory_space<vmem>>, %arg8: memref<32x4xf32, #tpu.memory_space<vmem>>, %arg9: memref<8x2x32xf32, #tpu.memory_space<vmem>>, %arg10: memref<8x2x32xf32, #tpu.memory_space<vmem>>, %arg11: memref<2x4x32xf32, #tpu.memory_space<vmem>>) attributes {dimension_semantics = [#tpu.dimension_semantics<arbitrary>], iteration_bounds = array<i64: 1>, scalar_prefetch = 0 : i64, scratch_operands = 0 : i64, tpu.core_type = #tpu.core_type<tc>, window_params = [{pipeline_mode = #tpu.pipeline_mode<synchronous>, transform_indices = @transform_0, window_bounds = array<i64: 8, 2, 128>}, {pipeline_mode = #tpu.pipeline_mode<synchronous>, transform_indices = @transform_1, window_bounds = array<i64: 8, 2, 1>}, {pipeline_mode = #tpu.pipeline_mode<synchronous>, transform_indices = @transform_2, window_bounds = array<i64: 8, 2, 1>}, {pipeline_mode = #tpu.pipeline_mode<synchronous>, transform_indices = @transform_3, window_bounds = array<i64: 32, 128>}, {pipeline_mode = #tpu.pipeline_mode<synchronous>, transform_indices = @transform_4, window_bounds = array<i64: 1, 128>}, {pipeline_mode = #tpu.pipeline_mode<synchronous>, transform_indices = @transform_5, window_bounds = array<i64: 32, 32>}, {pipeline_mode = #tpu.pipeline_mode<synchronous>, transform_indices = @transform_6, window_bounds = array<i64: 1, 32>}, {pipeline_mode = #tpu.pipeline_mode<synchronous>, transform_indices = @transform_7, window_bounds = array<i64: 32, 4>}, {pipeline_mode = #tpu.pipeline_mode<synchronous>, transform_indices = @transform_8, window_bounds = array<i64: 8, 2, 32>}, {pipeline_mode = #tpu.pipeline_mode<synchronous>, transform_indices = @transform_9, window_bounds = array<i64: 8, 2, 32>}, {pipeline_mode = #tpu.pipeline_mode<synchronous>, transform_indices = @transform_10, window_bounds = array<i64: 2, 4, 32>}]} {
    %c0 = arith.constant 0 : index
    %c0_0 = arith.constant 0 : index
    %0 = vector.load %arg4[%c0, %c0_0] : memref<32x128xf32, #tpu.memory_space<vmem>>, vector<32x128xf32>
    %c0_1 = arith.constant 0 : index
    %c0_2 = arith.constant 0 : index
    %1 = vector.load %arg5[%c0_1, %c0_2] : memref<1x128xf32, #tpu.memory_space<vmem>>, vector<1x128xf32>
    %c0_3 = arith.constant 0 : index
    %c0_4 = arith.constant 0 : index
    %2 = vector.load %arg6[%c0_3, %c0_4] : memref<32x32xf32, #tpu.memory_space<vmem>>, vector<32x32xf32>
    %c0_5 = arith.constant 0 : index
    %c0_6 = arith.constant 0 : index
    %3 = vector.load %arg7[%c0_5, %c0_6] : memref<1x32xf32, #tpu.memory_space<vmem>>, vector<1x32xf32>
    %cst = arith.constant 0.000000e+00 : f32
    %4 = vector.broadcast %cst : f32 to vector<2x32xf32>
    %cst_7 = arith.constant 0.000000e+00 : f32
    %5 = vector.broadcast %cst_7 : f32 to vector<2x32xf32>
    %c0_i32 = arith.constant 0 : i32
    %6 = arith.index_cast %c0_i32 : i32 to index
    %c0_8 = arith.constant 0 : index
    %c0_9 = arith.constant 0 : index
    %7 = vector.load %arg1[%6, %c0_8, %c0_9] : memref<8x2x128xf32, #tpu.memory_space<vmem>>, vector<1x2x128xf32>
    %8 = vector.shape_cast %7 : vector<1x2x128xf32> to vector<2x128xf32>
    %9 = arith.index_cast %c0_i32 : i32 to index
    %c0_10 = arith.constant 0 : index
    %c0_11 = arith.constant 0 : index
    %10 = vector.load %arg2[%9, %c0_10, %c0_11] : memref<8x2x1xf32, #tpu.memory_space<vmem>>, vector<1x2x1xf32>
    %11 = vector.shape_cast %10 : vector<1x2x1xf32> to vector<2x1xf32>
    %12 = tpu.reciprocal %11 {approx = true} : vector<2x1xf32> -> vector<2x1xf32>
    %cst_12 = arith.constant dense<0.000000e+00> : vector<2x32xf32>
    %13 = tpu.matmul %5, %2, %cst_12 {dimension_numbers = #tpu.dot_dimension_numbers<[1], [0], [0], [1], [0, 0, 1, 1], [], []>} : vector<2x32xf32>, vector<32x32xf32>, vector<2x32xf32> -> vector<2x32xf32>
    %14 = vector.broadcast %3 : vector<1x32xf32> to vector<2x32xf32>
    %15 = arith.addf %13, %14 : vector<2x32xf32>
    %16 = math.tanh %15 : vector<2x32xf32>
    %17 = arith.subf %5, %16 : vector<2x32xf32>
    %18 = vector.broadcast %12 : vector<2x1xf32> to vector<2x32xf32>
    %19 = arith.mulf %16, %18 : vector<2x32xf32>
    %20 = arith.addf %17, %19 : vector<2x32xf32>
    %cst_13 = arith.constant dense<0.000000e+00> : vector<2x128xf32>
    %21 = tpu.matmul %4, %0, %cst_13 {dimension_numbers = #tpu.dot_dimension_numbers<[1], [0], [0], [1], [0, 0, 1, 1], [], []>} : vector<2x32xf32>, vector<32x128xf32>, vector<2x128xf32> -> vector<2x128xf32>
    %22 = arith.addf %8, %21 : vector<2x128xf32>
    %23 = vector.broadcast %1 : vector<1x128xf32> to vector<2x128xf32>
    %24 = arith.addf %22, %23 : vector<2x128xf32>
    %25 = vector.extract_strided_slice %24 {offsets = [0, 0], sizes = [2, 32], strides = [1, 1]} : vector<2x128xf32> to vector<2x32xf32>
    %26 = arith.negf %25 : vector<2x32xf32>
    %27 = math.exp %26 : vector<2x32xf32>
    %cst_14 = arith.constant 1.000000e+00 : f32
    %28 = vector.broadcast %cst_14 : f32 to vector<2x32xf32>
    %29 = arith.addf %28, %27 : vector<2x32xf32>
    %30 = arith.divf %28, %29 : vector<2x32xf32>
    %31 = vector.extract_strided_slice %24 {offsets = [0, 32], sizes = [2, 32], strides = [1, 1]} : vector<2x128xf32> to vector<2x32xf32>
    %32 = arith.negf %31 : vector<2x32xf32>
    %33 = math.exp %32 : vector<2x32xf32>
    %cst_15 = arith.constant 1.000000e+00 : f32
    %34 = vector.broadcast %cst_15 : f32 to vector<2x32xf32>
    %35 = arith.addf %34, %33 : vector<2x32xf32>
    %36 = arith.divf %34, %35 : vector<2x32xf32>
    %37 = vector.extract_strided_slice %24 {offsets = [0, 64], sizes = [2, 32], strides = [1, 1]} : vector<2x128xf32> to vector<2x32xf32>
    %38 = arith.negf %37 : vector<2x32xf32>
    %39 = math.exp %38 : vector<2x32xf32>
    %cst_16 = arith.constant 1.000000e+00 : f32
    %40 = vector.broadcast %cst_16 : f32 to vector<2x32xf32>
    %41 = arith.addf %40, %39 : vector<2x32xf32>
    %42 = arith.divf %40, %41 : vector<2x32xf32>
    %43 = vector.extract_strided_slice %24 {offsets = [0, 96], sizes = [2, 32], strides = [1, 1]} : vector<2x128xf32> to vector<2x32xf32>
    %44 = math.tanh %43 : vector<2x32xf32>
    %45 = arith.mulf %20, %36 : vector<2x32xf32>
    %46 = arith.mulf %30, %44 : vector<2x32xf32>
    %47 = arith.addf %45, %46 : vector<2x32xf32>
    %48 = math.tanh %47 : vector<2x32xf32>
    %49 = arith.mulf %42, %48 : vector<2x32xf32>
    %50 = arith.index_cast %c0_i32 : i32 to index
    %c0_17 = arith.constant 0 : index
    %c0_18 = arith.constant 0 : index
    %51 = vector.load %arg9[%50, %c0_17, %c0_18] : memref<8x2x32xf32, #tpu.memory_space<vmem>>, vector<1x2x32xf32>
    %52 = vector.shape_cast %51 : vector<1x2x32xf32> to vector<2x32xf32>
    %53 = vector.shape_cast %49 : vector<2x32xf32> to vector<1x2x32xf32>
    tpu.vector_store %arg9[%50, %c0_17, %c0_18], %53 {strides = array<i32>} : memref<8x2x32xf32, #tpu.memory_space<vmem>>, vector<1x2x32xf32>,
    %54 = arith.index_cast %c0_i32 : i32 to index
    %c0_19 = arith.constant 0 : index
    %c0_20 = arith.constant 0 : index
    %55 = vector.load %arg10[%54, %c0_19, %c0_20] : memref<8x2x32xf32, #tpu.memory_space<vmem>>, vector<1x2x32xf32>
    %56 = vector.shape_cast %55 : vector<1x2x32xf32> to vector<2x32xf32>
    %57 = vector.shape_cast %47 : vector<2x32xf32> to vector<1x2x32xf32>
    tpu.vector_store %arg10[%54, %c0_19, %c0_20], %57 {strides = array<i32>} : memref<8x2x32xf32, #tpu.memory_space<vmem>>, vector<1x2x32xf32>,
    %c1_i32 = arith.constant 1 : i32
    %58 = arith.index_cast %c1_i32 : i32 to index
    %c0_21 = arith.constant 0 : index
    %c0_22 = arith.constant 0 : index
    %59 = vector.load %arg1[%58, %c0_21, %c0_22] : memref<8x2x128xf32, #tpu.memory_space<vmem>>, vector<1x2x128xf32>
    %60 = vector.shape_cast %59 : vector<1x2x128xf32> to vector<2x128xf32>
    %61 = arith.index_cast %c1_i32 : i32 to index
    %c0_23 = arith.constant 0 : index
    %c0_24 = arith.constant 0 : index
    %62 = vector.load %arg2[%61, %c0_23, %c0_24] : memref<8x2x1xf32, #tpu.memory_space<vmem>>, vector<1x2x1xf32>
    %63 = vector.shape_cast %62 : vector<1x2x1xf32> to vector<2x1xf32>
    %64 = tpu.reciprocal %63 {approx = true} : vector<2x1xf32> -> vector<2x1xf32>
    %cst_25 = arith.constant dense<0.000000e+00> : vector<2x32xf32>
    %65 = tpu.matmul %47, %2, %cst_25 {dimension_numbers = #tpu.dot_dimension_numbers<[1], [0], [0], [1], [0, 0, 1, 1], [], []>} : vector<2x32xf32>, vector<32x32xf32>, vector<2x32xf32> -> vector<2x32xf32>
    %66 = vector.broadcast %3 : vector<1x32xf32> to vector<2x32xf32>
    %67 = arith.addf %65, %66 : vector<2x32xf32>
    %68 = math.tanh %67 : vector<2x32xf32>
    %69 = arith.subf %47, %68 : vector<2x32xf32>
    %70 = vector.broadcast %64 : vector<2x1xf32> to vector<2x32xf32>
    %71 = arith.mulf %68, %70 : vector<2x32xf32>
    %72 = arith.addf %69, %71 : vector<2x32xf32>
    %cst_26 = arith.constant dense<0.000000e+00> : vector<2x128xf32>
    %73 = tpu.matmul %49, %0, %cst_26 {dimension_numbers = #tpu.dot_dimension_numbers<[1], [0], [0], [1], [0, 0, 1, 1], [], []>} : vector<2x32xf32>, vector<32x128xf32>, vector<2x128xf32> -> vector<2x128xf32>
    %74 = arith.addf %60, %73 : vector<2x128xf32>
    %75 = vector.broadcast %1 : vector<1x128xf32> to vector<2x128xf32>
    %76 = arith.addf %74, %75 : vector<2x128xf32>
    %77 = vector.extract_strided_slice %76 {offsets = [0, 0], sizes = [2, 32], strides = [1, 1]} : vector<2x128xf32> to vector<2x32xf32>
    %78 = arith.negf %77 : vector<2x32xf32>
    %79 = math.exp %78 : vector<2x32xf32>
    %cst_27 = arith.constant 1.000000e+00 : f32
    %80 = vector.broadcast %cst_27 : f32 to vector<2x32xf32>
    %81 = arith.addf %80, %79 : vector<2x32xf32>
    %82 = arith.divf %80, %81 : vector<2x32xf32>
    %83 = vector.extract_strided_slice %76 {offsets = [0, 32], sizes = [2, 32], strides = [1, 1]} : vector<2x128xf32> to vector<2x32xf32>
    %84 = arith.negf %83 : vector<2x32xf32>
    %85 = math.exp %84 : vector<2x32xf32>
    %cst_28 = arith.constant 1.000000e+00 : f32
    %86 = vector.broadcast %cst_28 : f32 to vector<2x32xf32>
    %87 = arith.addf %86, %85 : vector<2x32xf32>
    %88 = arith.divf %86, %87 : vector<2x32xf32>
    %89 = vector.extract_strided_slice %76 {offsets = [0, 64], sizes = [2, 32], strides = [1, 1]} : vector<2x128xf32> to vector<2x32xf32>
    %90 = arith.negf %89 : vector<2x32xf32>
    %91 = math.exp %90 : vector<2x32xf32>
    %cst_29 = arith.constant 1.000000e+00 : f32
    %92 = vector.broadcast %cst_29 : f32 to vector<2x32xf32>
    %93 = arith.addf %92, %91 : vector<2x32xf32>
    %94 = arith.divf %92, %93 : vector<2x32xf32>
    %95 = vector.extract_strided_slice %76 {offsets = [0, 96], sizes = [2, 32], strides = [1, 1]} : vector<2x128xf32> to vector<2x32xf32>
    %96 = math.tanh %95 : vector<2x32xf32>
    %97 = arith.mulf %72, %88 : vector<2x32xf32>
    %98 = arith.mulf %82, %96 : vector<2x32xf32>
    %99 = arith.addf %97, %98 : vector<2x32xf32>
    %100 = math.tanh %99 : vector<2x32xf32>
    %101 = arith.mulf %94, %100 : vector<2x32xf32>
    %102 = arith.index_cast %c1_i32 : i32 to index
    %c0_30 = arith.constant 0 : index
    %c0_31 = arith.constant 0 : index
    %103 = vector.load %arg9[%102, %c0_30, %c0_31] : memref<8x2x32xf32, #tpu.memory_space<vmem>>, vector<1x2x32xf32>
    %104 = vector.shape_cast %103 : vector<1x2x32xf32> to vector<2x32xf32>
    %105 = vector.shape_cast %101 : vector<2x32xf32> to vector<1x2x32xf32>
    tpu.vector_store %arg9[%102, %c0_30, %c0_31], %105 {strides = array<i32>} : memref<8x2x32xf32, #tpu.memory_space<vmem>>, vector<1x2x32xf32>,
    %106 = arith.index_cast %c1_i32 : i32 to index
    %c0_32 = arith.constant 0 : index
    %c0_33 = arith.constant 0 : index
    %107 = vector.load %arg10[%106, %c0_32, %c0_33] : memref<8x2x32xf32, #tpu.memory_space<vmem>>, vector<1x2x32xf32>
    %108 = vector.shape_cast %107 : vector<1x2x32xf32> to vector<2x32xf32>
    %109 = vector.shape_cast %99 : vector<2x32xf32> to vector<1x2x32xf32>
    tpu.vector_store %arg10[%106, %c0_32, %c0_33], %109 {strides = array<i32>} : memref<8x2x32xf32, #tpu.memory_space<vmem>>, vector<1x2x32xf32>,
    %c2_i32 = arith.constant 2 : i32
    %110 = arith.index_cast %c2_i32 : i32 to index
    %c0_34 = arith.constant 0 : index
    %c0_35 = arith.constant 0 : index
    %111 = vector.load %arg1[%110, %c0_34, %c0_35] : memref<8x2x128xf32, #tpu.memory_space<vmem>>, vector<1x2x128xf32>
    %112 = vector.shape_cast %111 : vector<1x2x128xf32> to vector<2x128xf32>
    %113 = arith.index_cast %c2_i32 : i32 to index
    %c0_36 = arith.constant 0 : index
    %c0_37 = arith.constant 0 : index
    %114 = vector.load %arg2[%113, %c0_36, %c0_37] : memref<8x2x1xf32, #tpu.memory_space<vmem>>, vector<1x2x1xf32>
    %115 = vector.shape_cast %114 : vector<1x2x1xf32> to vector<2x1xf32>
    %116 = tpu.reciprocal %115 {approx = true} : vector<2x1xf32> -> vector<2x1xf32>
    %cst_38 = arith.constant dense<0.000000e+00> : vector<2x32xf32>
    %117 = tpu.matmul %99, %2, %cst_38 {dimension_numbers = #tpu.dot_dimension_numbers<[1], [0], [0], [1], [0, 0, 1, 1], [], []>} : vector<2x32xf32>, vector<32x32xf32>, vector<2x32xf32> -> vector<2x32xf32>
    %118 = vector.broadcast %3 : vector<1x32xf32> to vector<2x32xf32>
    %119 = arith.addf %117, %118 : vector<2x32xf32>
    %120 = math.tanh %119 : vector<2x32xf32>
    %121 = arith.subf %99, %120 : vector<2x32xf32>
    %122 = vector.broadcast %116 : vector<2x1xf32> to vector<2x32xf32>
    %123 = arith.mulf %120, %122 : vector<2x32xf32>
    %124 = arith.addf %121, %123 : vector<2x32xf32>
    %cst_39 = arith.constant dense<0.000000e+00> : vector<2x128xf32>
    %125 = tpu.matmul %101, %0, %cst_39 {dimension_numbers = #tpu.dot_dimension_numbers<[1], [0], [0], [1], [0, 0, 1, 1], [], []>} : vector<2x32xf32>, vector<32x128xf32>, vector<2x128xf32> -> vector<2x128xf32>
    %126 = arith.addf %112, %125 : vector<2x128xf32>
    %127 = vector.broadcast %1 : vector<1x128xf32> to vector<2x128xf32>
    %128 = arith.addf %126, %127 : vector<2x128xf32>
    %129 = vector.extract_strided_slice %128 {offsets = [0, 0], sizes = [2, 32], strides = [1, 1]} : vector<2x128xf32> to vector<2x32xf32>
    %130 = arith.negf %129 : vector<2x32xf32>
    %131 = math.exp %130 : vector<2x32xf32>
    %cst_40 = arith.constant 1.000000e+00 : f32
    %132 = vector.broadcast %cst_40 : f32 to vector<2x32xf32>
    %133 = arith.addf %132, %131 : vector<2x32xf32>
    %134 = arith.divf %132, %133 : vector<2x32xf32>
    %135 = vector.extract_strided_slice %128 {offsets = [0, 32], sizes = [2, 32], strides = [1, 1]} : vector<2x128xf32> to vector<2x32xf32>
    %136 = arith.negf %135 : vector<2x32xf32>
    %137 = math.exp %136 : vector<2x32xf32>
    %cst_41 = arith.constant 1.000000e+00 : f32
    %138 = vector.broadcast %cst_41 : f32 to vector<2x32xf32>
    %139 = arith.addf %138, %137 : vector<2x32xf32>
    %140 = arith.divf %138, %139 : vector<2x32xf32>
    %141 = vector.extract_strided_slice %128 {offsets = [0, 64], sizes = [2, 32], strides = [1, 1]} : vector<2x128xf32> to vector<2x32xf32>
    %142 = arith.negf %141 : vector<2x32xf32>
    %143 = math.exp %142 : vector<2x32xf32>
    %cst_42 = arith.constant 1.000000e+00 : f32
    %144 = vector.broadcast %cst_42 : f32 to vector<2x32xf32>
    %145 = arith.addf %144, %143 : vector<2x32xf32>
    %146 = arith.divf %144, %145 : vector<2x32xf32>
    %147 = vector.extract_strided_slice %128 {offsets = [0, 96], sizes = [2, 32], strides = [1, 1]} : vector<2x128xf32> to vector<2x32xf32>
    %148 = math.tanh %147 : vector<2x32xf32>
    %149 = arith.mulf %124, %140 : vector<2x32xf32>
    %150 = arith.mulf %134, %148 : vector<2x32xf32>
    %151 = arith.addf %149, %150 : vector<2x32xf32>
    %152 = math.tanh %151 : vector<2x32xf32>
    %153 = arith.mulf %146, %152 : vector<2x32xf32>
    %154 = arith.index_cast %c2_i32 : i32 to index
    %c0_43 = arith.constant 0 : index
    %c0_44 = arith.constant 0 : index
    %155 = vector.load %arg9[%154, %c0_43, %c0_44] : memref<8x2x32xf32, #tpu.memory_space<vmem>>, vector<1x2x32xf32>
    %156 = vector.shape_cast %155 : vector<1x2x32xf32> to vector<2x32xf32>
    %157 = vector.shape_cast %153 : vector<2x32xf32> to vector<1x2x32xf32>
    tpu.vector_store %arg9[%154, %c0_43, %c0_44], %157 {strides = array<i32>} : memref<8x2x32xf32, #tpu.memory_space<vmem>>, vector<1x2x32xf32>,
    %158 = arith.index_cast %c2_i32 : i32 to index
    %c0_45 = arith.constant 0 : index
    %c0_46 = arith.constant 0 : index
    %159 = vector.load %arg10[%158, %c0_45, %c0_46] : memref<8x2x32xf32, #tpu.memory_space<vmem>>, vector<1x2x32xf32>
    %160 = vector.shape_cast %159 : vector<1x2x32xf32> to vector<2x32xf32>
    %161 = vector.shape_cast %151 : vector<2x32xf32> to vector<1x2x32xf32>
    tpu.vector_store %arg10[%158, %c0_45, %c0_46], %161 {strides = array<i32>} : memref<8x2x32xf32, #tpu.memory_space<vmem>>, vector<1x2x32xf32>,
    %c3_i32 = arith.constant 3 : i32
    %162 = arith.index_cast %c3_i32 : i32 to index
    %c0_47 = arith.constant 0 : index
    %c0_48 = arith.constant 0 : index
    %163 = vector.load %arg1[%162, %c0_47, %c0_48] : memref<8x2x128xf32, #tpu.memory_space<vmem>>, vector<1x2x128xf32>
    %164 = vector.shape_cast %163 : vector<1x2x128xf32> to vector<2x128xf32>
    %165 = arith.index_cast %c3_i32 : i32 to index
    %c0_49 = arith.constant 0 : index
    %c0_50 = arith.constant 0 : index
    %166 = vector.load %arg2[%165, %c0_49, %c0_50] : memref<8x2x1xf32, #tpu.memory_space<vmem>>, vector<1x2x1xf32>
    %167 = vector.shape_cast %166 : vector<1x2x1xf32> to vector<2x1xf32>
    %168 = tpu.reciprocal %167 {approx = true} : vector<2x1xf32> -> vector<2x1xf32>
    %cst_51 = arith.constant dense<0.000000e+00> : vector<2x32xf32>
    %169 = tpu.matmul %151, %2, %cst_51 {dimension_numbers = #tpu.dot_dimension_numbers<[1], [0], [0], [1], [0, 0, 1, 1], [], []>} : vector<2x32xf32>, vector<32x32xf32>, vector<2x32xf32> -> vector<2x32xf32>
    %170 = vector.broadcast %3 : vector<1x32xf32> to vector<2x32xf32>
    %171 = arith.addf %169, %170 : vector<2x32xf32>
    %172 = math.tanh %171 : vector<2x32xf32>
    %173 = arith.subf %151, %172 : vector<2x32xf32>
    %174 = vector.broadcast %168 : vector<2x1xf32> to vector<2x32xf32>
    %175 = arith.mulf %172, %174 : vector<2x32xf32>
    %176 = arith.addf %173, %175 : vector<2x32xf32>
    %cst_52 = arith.constant dense<0.000000e+00> : vector<2x128xf32>
    %177 = tpu.matmul %153, %0, %cst_52 {dimension_numbers = #tpu.dot_dimension_numbers<[1], [0], [0], [1], [0, 0, 1, 1], [], []>} : vector<2x32xf32>, vector<32x128xf32>, vector<2x128xf32> -> vector<2x128xf32>
    %178 = arith.addf %164, %177 : vector<2x128xf32>
    %179 = vector.broadcast %1 : vector<1x128xf32> to vector<2x128xf32>
    %180 = arith.addf %178, %179 : vector<2x128xf32>
    %181 = vector.extract_strided_slice %180 {offsets = [0, 0], sizes = [2, 32], strides = [1, 1]} : vector<2x128xf32> to vector<2x32xf32>
    %182 = arith.negf %181 : vector<2x32xf32>
    %183 = math.exp %182 : vector<2x32xf32>
    %cst_53 = arith.constant 1.000000e+00 : f32
    %184 = vector.broadcast %cst_53 : f32 to vector<2x32xf32>
    %185 = arith.addf %184, %183 : vector<2x32xf32>
    %186 = arith.divf %184, %185 : vector<2x32xf32>
    %187 = vector.extract_strided_slice %180 {offsets = [0, 32], sizes = [2, 32], strides = [1, 1]} : vector<2x128xf32> to vector<2x32xf32>
    %188 = arith.negf %187 : vector<2x32xf32>
    %189 = math.exp %188 : vector<2x32xf32>
    %cst_54 = arith.constant 1.000000e+00 : f32
    %190 = vector.broadcast %cst_54 : f32 to vector<2x32xf32>
    %191 = arith.addf %190, %189 : vector<2x32xf32>
    %192 = arith.divf %190, %191 : vector<2x32xf32>
    %193 = vector.extract_strided_slice %180 {offsets = [0, 64], sizes = [2, 32], strides = [1, 1]} : vector<2x128xf32> to vector<2x32xf32>
    %194 = arith.negf %193 : vector<2x32xf32>
    %195 = math.exp %194 : vector<2x32xf32>
    %cst_55 = arith.constant 1.000000e+00 : f32
    %196 = vector.broadcast %cst_55 : f32 to vector<2x32xf32>
    %197 = arith.addf %196, %195 : vector<2x32xf32>
    %198 = arith.divf %196, %197 : vector<2x32xf32>
    %199 = vector.extract_strided_slice %180 {offsets = [0, 96], sizes = [2, 32], strides = [1, 1]} : vector<2x128xf32> to vector<2x32xf32>
    %200 = math.tanh %199 : vector<2x32xf32>
    %201 = arith.mulf %176, %192 : vector<2x32xf32>
    %202 = arith.mulf %186, %200 : vector<2x32xf32>
    %203 = arith.addf %201, %202 : vector<2x32xf32>
    %204 = math.tanh %203 : vector<2x32xf32>
    %205 = arith.mulf %198, %204 : vector<2x32xf32>
    %206 = arith.index_cast %c3_i32 : i32 to index
    %c0_56 = arith.constant 0 : index
    %c0_57 = arith.constant 0 : index
    %207 = vector.load %arg9[%206, %c0_56, %c0_57] : memref<8x2x32xf32, #tpu.memory_space<vmem>>, vector<1x2x32xf32>
    %208 = vector.shape_cast %207 : vector<1x2x32xf32> to vector<2x32xf32>
    %209 = vector.shape_cast %205 : vector<2x32xf32> to vector<1x2x32xf32>
    tpu.vector_store %arg9[%206, %c0_56, %c0_57], %209 {strides = array<i32>} : memref<8x2x32xf32, #tpu.memory_space<vmem>>, vector<1x2x32xf32>,
    %210 = arith.index_cast %c3_i32 : i32 to index
    %c0_58 = arith.constant 0 : index
    %c0_59 = arith.constant 0 : index
    %211 = vector.load %arg10[%210, %c0_58, %c0_59] : memref<8x2x32xf32, #tpu.memory_space<vmem>>, vector<1x2x32xf32>
    %212 = vector.shape_cast %211 : vector<1x2x32xf32> to vector<2x32xf32>
    %213 = vector.shape_cast %203 : vector<2x32xf32> to vector<1x2x32xf32>
    tpu.vector_store %arg10[%210, %c0_58, %c0_59], %213 {strides = array<i32>} : memref<8x2x32xf32, #tpu.memory_space<vmem>>, vector<1x2x32xf32>,
    %c4_i32 = arith.constant 4 : i32
    %214 = arith.index_cast %c4_i32 : i32 to index
    %c0_60 = arith.constant 0 : index
    %c0_61 = arith.constant 0 : index
    %215 = vector.load %arg1[%214, %c0_60, %c0_61] : memref<8x2x128xf32, #tpu.memory_space<vmem>>, vector<1x2x128xf32>
    %216 = vector.shape_cast %215 : vector<1x2x128xf32> to vector<2x128xf32>
    %217 = arith.index_cast %c4_i32 : i32 to index
    %c0_62 = arith.constant 0 : index
    %c0_63 = arith.constant 0 : index
    %218 = vector.load %arg2[%217, %c0_62, %c0_63] : memref<8x2x1xf32, #tpu.memory_space<vmem>>, vector<1x2x1xf32>
    %219 = vector.shape_cast %218 : vector<1x2x1xf32> to vector<2x1xf32>
    %220 = tpu.reciprocal %219 {approx = true} : vector<2x1xf32> -> vector<2x1xf32>
    %cst_64 = arith.constant dense<0.000000e+00> : vector<2x32xf32>
    %221 = tpu.matmul %203, %2, %cst_64 {dimension_numbers = #tpu.dot_dimension_numbers<[1], [0], [0], [1], [0, 0, 1, 1], [], []>} : vector<2x32xf32>, vector<32x32xf32>, vector<2x32xf32> -> vector<2x32xf32>
    %222 = vector.broadcast %3 : vector<1x32xf32> to vector<2x32xf32>
    %223 = arith.addf %221, %222 : vector<2x32xf32>
    %224 = math.tanh %223 : vector<2x32xf32>
    %225 = arith.subf %203, %224 : vector<2x32xf32>
    %226 = vector.broadcast %220 : vector<2x1xf32> to vector<2x32xf32>
    %227 = arith.mulf %224, %226 : vector<2x32xf32>
    %228 = arith.addf %225, %227 : vector<2x32xf32>
    %cst_65 = arith.constant dense<0.000000e+00> : vector<2x128xf32>
    %229 = tpu.matmul %205, %0, %cst_65 {dimension_numbers = #tpu.dot_dimension_numbers<[1], [0], [0], [1], [0, 0, 1, 1], [], []>} : vector<2x32xf32>, vector<32x128xf32>, vector<2x128xf32> -> vector<2x128xf32>
    %230 = arith.addf %216, %229 : vector<2x128xf32>
    %231 = vector.broadcast %1 : vector<1x128xf32> to vector<2x128xf32>
    %232 = arith.addf %230, %231 : vector<2x128xf32>
    %233 = vector.extract_strided_slice %232 {offsets = [0, 0], sizes = [2, 32], strides = [1, 1]} : vector<2x128xf32> to vector<2x32xf32>
    %234 = arith.negf %233 : vector<2x32xf32>
    %235 = math.exp %234 : vector<2x32xf32>
    %cst_66 = arith.constant 1.000000e+00 : f32
    %236 = vector.broadcast %cst_66 : f32 to vector<2x32xf32>
    %237 = arith.addf %236, %235 : vector<2x32xf32>
    %238 = arith.divf %236, %237 : vector<2x32xf32>
    %239 = vector.extract_strided_slice %232 {offsets = [0, 32], sizes = [2, 32], strides = [1, 1]} : vector<2x128xf32> to vector<2x32xf32>
    %240 = arith.negf %239 : vector<2x32xf32>
    %241 = math.exp %240 : vector<2x32xf32>
    %cst_67 = arith.constant 1.000000e+00 : f32
    %242 = vector.broadcast %cst_67 : f32 to vector<2x32xf32>
    %243 = arith.addf %242, %241 : vector<2x32xf32>
    %244 = arith.divf %242, %243 : vector<2x32xf32>
    %245 = vector.extract_strided_slice %232 {offsets = [0, 64], sizes = [2, 32], strides = [1, 1]} : vector<2x128xf32> to vector<2x32xf32>
    %246 = arith.negf %245 : vector<2x32xf32>
    %247 = math.exp %246 : vector<2x32xf32>
    %cst_68 = arith.constant 1.000000e+00 : f32
    %248 = vector.broadcast %cst_68 : f32 to vector<2x32xf32>
    %249 = arith.addf %248, %247 : vector<2x32xf32>
    %250 = arith.divf %248, %249 : vector<2x32xf32>
    %251 = vector.extract_strided_slice %232 {offsets = [0, 96], sizes = [2, 32], strides = [1, 1]} : vector<2x128xf32> to vector<2x32xf32>
    %252 = math.tanh %251 : vector<2x32xf32>
    %253 = arith.mulf %228, %244 : vector<2x32xf32>
    %254 = arith.mulf %238, %252 : vector<2x32xf32>
    %255 = arith.addf %253, %254 : vector<2x32xf32>
    %256 = math.tanh %255 : vector<2x32xf32>
    %257 = arith.mulf %250, %256 : vector<2x32xf32>
    %258 = arith.index_cast %c4_i32 : i32 to index
    %c0_69 = arith.constant 0 : index
    %c0_70 = arith.constant 0 : index
    %259 = vector.load %arg9[%258, %c0_69, %c0_70] : memref<8x2x32xf32, #tpu.memory_space<vmem>>, vector<1x2x32xf32>
    %260 = vector.shape_cast %259 : vector<1x2x32xf32> to vector<2x32xf32>
    %261 = vector.shape_cast %257 : vector<2x32xf32> to vector<1x2x32xf32>
    tpu.vector_store %arg9[%258, %c0_69, %c0_70], %261 {strides = array<i32>} : memref<8x2x32xf32, #tpu.memory_space<vmem>>, vector<1x2x32xf32>,
    %262 = arith.index_cast %c4_i32 : i32 to index
    %c0_71 = arith.constant 0 : index
    %c0_72 = arith.constant 0 : index
    %263 = vector.load %arg10[%262, %c0_71, %c0_72] : memref<8x2x32xf32, #tpu.memory_space<vmem>>, vector<1x2x32xf32>
    %264 = vector.shape_cast %263 : vector<1x2x32xf32> to vector<2x32xf32>
    %265 = vector.shape_cast %255 : vector<2x32xf32> to vector<1x2x32xf32>
    tpu.vector_store %arg10[%262, %c0_71, %c0_72], %265 {strides = array<i32>} : memref<8x2x32xf32, #tpu.memory_space<vmem>>, vector<1x2x32xf32>,
    %c5_i32 = arith.constant 5 : i32
    %266 = arith.index_cast %c5_i32 : i32 to index
    %c0_73 = arith.constant 0 : index
    %c0_74 = arith.constant 0 : index
    %267 = vector.load %arg1[%266, %c0_73, %c0_74] : memref<8x2x128xf32, #tpu.memory_space<vmem>>, vector<1x2x128xf32>
    %268 = vector.shape_cast %267 : vector<1x2x128xf32> to vector<2x128xf32>
    %269 = arith.index_cast %c5_i32 : i32 to index
    %c0_75 = arith.constant 0 : index
    %c0_76 = arith.constant 0 : index
    %270 = vector.load %arg2[%269, %c0_75, %c0_76] : memref<8x2x1xf32, #tpu.memory_space<vmem>>, vector<1x2x1xf32>
    %271 = vector.shape_cast %270 : vector<1x2x1xf32> to vector<2x1xf32>
    %272 = tpu.reciprocal %271 {approx = true} : vector<2x1xf32> -> vector<2x1xf32>
    %cst_77 = arith.constant dense<0.000000e+00> : vector<2x32xf32>
    %273 = tpu.matmul %255, %2, %cst_77 {dimension_numbers = #tpu.dot_dimension_numbers<[1], [0], [0], [1], [0, 0, 1, 1], [], []>} : vector<2x32xf32>, vector<32x32xf32>, vector<2x32xf32> -> vector<2x32xf32>
    %274 = vector.broadcast %3 : vector<1x32xf32> to vector<2x32xf32>
    %275 = arith.addf %273, %274 : vector<2x32xf32>
    %276 = math.tanh %275 : vector<2x32xf32>
    %277 = arith.subf %255, %276 : vector<2x32xf32>
    %278 = vector.broadcast %272 : vector<2x1xf32> to vector<2x32xf32>
    %279 = arith.mulf %276, %278 : vector<2x32xf32>
    %280 = arith.addf %277, %279 : vector<2x32xf32>
    %cst_78 = arith.constant dense<0.000000e+00> : vector<2x128xf32>
    %281 = tpu.matmul %257, %0, %cst_78 {dimension_numbers = #tpu.dot_dimension_numbers<[1], [0], [0], [1], [0, 0, 1, 1], [], []>} : vector<2x32xf32>, vector<32x128xf32>, vector<2x128xf32> -> vector<2x128xf32>
    %282 = arith.addf %268, %281 : vector<2x128xf32>
    %283 = vector.broadcast %1 : vector<1x128xf32> to vector<2x128xf32>
    %284 = arith.addf %282, %283 : vector<2x128xf32>
    %285 = vector.extract_strided_slice %284 {offsets = [0, 0], sizes = [2, 32], strides = [1, 1]} : vector<2x128xf32> to vector<2x32xf32>
    %286 = arith.negf %285 : vector<2x32xf32>
    %287 = math.exp %286 : vector<2x32xf32>
    %cst_79 = arith.constant 1.000000e+00 : f32
    %288 = vector.broadcast %cst_79 : f32 to vector<2x32xf32>
    %289 = arith.addf %288, %287 : vector<2x32xf32>
    %290 = arith.divf %288, %289 : vector<2x32xf32>
    %291 = vector.extract_strided_slice %284 {offsets = [0, 32], sizes = [2, 32], strides = [1, 1]} : vector<2x128xf32> to vector<2x32xf32>
    %292 = arith.negf %291 : vector<2x32xf32>
    %293 = math.exp %292 : vector<2x32xf32>
    %cst_80 = arith.constant 1.000000e+00 : f32
    %294 = vector.broadcast %cst_80 : f32 to vector<2x32xf32>
    %295 = arith.addf %294, %293 : vector<2x32xf32>
    %296 = arith.divf %294, %295 : vector<2x32xf32>
    %297 = vector.extract_strided_slice %284 {offsets = [0, 64], sizes = [2, 32], strides = [1, 1]} : vector<2x128xf32> to vector<2x32xf32>
    %298 = arith.negf %297 : vector<2x32xf32>
    %299 = math.exp %298 : vector<2x32xf32>
    %cst_81 = arith.constant 1.000000e+00 : f32
    %300 = vector.broadcast %cst_81 : f32 to vector<2x32xf32>
    %301 = arith.addf %300, %299 : vector<2x32xf32>
    %302 = arith.divf %300, %301 : vector<2x32xf32>
    %303 = vector.extract_strided_slice %284 {offsets = [0, 96], sizes = [2, 32], strides = [1, 1]} : vector<2x128xf32> to vector<2x32xf32>
    %304 = math.tanh %303 : vector<2x32xf32>
    %305 = arith.mulf %280, %296 : vector<2x32xf32>
    %306 = arith.mulf %290, %304 : vector<2x32xf32>
    %307 = arith.addf %305, %306 : vector<2x32xf32>
    %308 = math.tanh %307 : vector<2x32xf32>
    %309 = arith.mulf %302, %308 : vector<2x32xf32>
    %310 = arith.index_cast %c5_i32 : i32 to index
    %c0_82 = arith.constant 0 : index
    %c0_83 = arith.constant 0 : index
    %311 = vector.load %arg9[%310, %c0_82, %c0_83] : memref<8x2x32xf32, #tpu.memory_space<vmem>>, vector<1x2x32xf32>
    %312 = vector.shape_cast %311 : vector<1x2x32xf32> to vector<2x32xf32>
    %313 = vector.shape_cast %309 : vector<2x32xf32> to vector<1x2x32xf32>
    tpu.vector_store %arg9[%310, %c0_82, %c0_83], %313 {strides = array<i32>} : memref<8x2x32xf32, #tpu.memory_space<vmem>>, vector<1x2x32xf32>,
    %314 = arith.index_cast %c5_i32 : i32 to index
    %c0_84 = arith.constant 0 : index
    %c0_85 = arith.constant 0 : index
    %315 = vector.load %arg10[%314, %c0_84, %c0_85] : memref<8x2x32xf32, #tpu.memory_space<vmem>>, vector<1x2x32xf32>
    %316 = vector.shape_cast %315 : vector<1x2x32xf32> to vector<2x32xf32>
    %317 = vector.shape_cast %307 : vector<2x32xf32> to vector<1x2x32xf32>
    tpu.vector_store %arg10[%314, %c0_84, %c0_85], %317 {strides = array<i32>} : memref<8x2x32xf32, #tpu.memory_space<vmem>>, vector<1x2x32xf32>,
    %c6_i32 = arith.constant 6 : i32
    %318 = arith.index_cast %c6_i32 : i32 to index
    %c0_86 = arith.constant 0 : index
    %c0_87 = arith.constant 0 : index
    %319 = vector.load %arg1[%318, %c0_86, %c0_87] : memref<8x2x128xf32, #tpu.memory_space<vmem>>, vector<1x2x128xf32>
    %320 = vector.shape_cast %319 : vector<1x2x128xf32> to vector<2x128xf32>
    %321 = arith.index_cast %c6_i32 : i32 to index
    %c0_88 = arith.constant 0 : index
    %c0_89 = arith.constant 0 : index
    %322 = vector.load %arg2[%321, %c0_88, %c0_89] : memref<8x2x1xf32, #tpu.memory_space<vmem>>, vector<1x2x1xf32>
    %323 = vector.shape_cast %322 : vector<1x2x1xf32> to vector<2x1xf32>
    %324 = tpu.reciprocal %323 {approx = true} : vector<2x1xf32> -> vector<2x1xf32>
    %cst_90 = arith.constant dense<0.000000e+00> : vector<2x32xf32>
    %325 = tpu.matmul %307, %2, %cst_90 {dimension_numbers = #tpu.dot_dimension_numbers<[1], [0], [0], [1], [0, 0, 1, 1], [], []>} : vector<2x32xf32>, vector<32x32xf32>, vector<2x32xf32> -> vector<2x32xf32>
    %326 = vector.broadcast %3 : vector<1x32xf32> to vector<2x32xf32>
    %327 = arith.addf %325, %326 : vector<2x32xf32>
    %328 = math.tanh %327 : vector<2x32xf32>
    %329 = arith.subf %307, %328 : vector<2x32xf32>
    %330 = vector.broadcast %324 : vector<2x1xf32> to vector<2x32xf32>
    %331 = arith.mulf %328, %330 : vector<2x32xf32>
    %332 = arith.addf %329, %331 : vector<2x32xf32>
    %cst_91 = arith.constant dense<0.000000e+00> : vector<2x128xf32>
    %333 = tpu.matmul %309, %0, %cst_91 {dimension_numbers = #tpu.dot_dimension_numbers<[1], [0], [0], [1], [0, 0, 1, 1], [], []>} : vector<2x32xf32>, vector<32x128xf32>, vector<2x128xf32> -> vector<2x128xf32>
    %334 = arith.addf %320, %333 : vector<2x128xf32>
    %335 = vector.broadcast %1 : vector<1x128xf32> to vector<2x128xf32>
    %336 = arith.addf %334, %335 : vector<2x128xf32>
    %337 = vector.extract_strided_slice %336 {offsets = [0, 0], sizes = [2, 32], strides = [1, 1]} : vector<2x128xf32> to vector<2x32xf32>
    %338 = arith.negf %337 : vector<2x32xf32>
    %339 = math.exp %338 : vector<2x32xf32>
    %cst_92 = arith.constant 1.000000e+00 : f32
    %340 = vector.broadcast %cst_92 : f32 to vector<2x32xf32>
    %341 = arith.addf %340, %339 : vector<2x32xf32>
    %342 = arith.divf %340, %341 : vector<2x32xf32>
    %343 = vector.extract_strided_slice %336 {offsets = [0, 32], sizes = [2, 32], strides = [1, 1]} : vector<2x128xf32> to vector<2x32xf32>
    %344 = arith.negf %343 : vector<2x32xf32>
    %345 = math.exp %344 : vector<2x32xf32>
    %cst_93 = arith.constant 1.000000e+00 : f32
    %346 = vector.broadcast %cst_93 : f32 to vector<2x32xf32>
    %347 = arith.addf %346, %345 : vector<2x32xf32>
    %348 = arith.divf %346, %347 : vector<2x32xf32>
    %349 = vector.extract_strided_slice %336 {offsets = [0, 64], sizes = [2, 32], strides = [1, 1]} : vector<2x128xf32> to vector<2x32xf32>
    %350 = arith.negf %349 : vector<2x32xf32>
    %351 = math.exp %350 : vector<2x32xf32>
    %cst_94 = arith.constant 1.000000e+00 : f32
    %352 = vector.broadcast %cst_94 : f32 to vector<2x32xf32>
    %353 = arith.addf %352, %351 : vector<2x32xf32>
    %354 = arith.divf %352, %353 : vector<2x32xf32>
    %355 = vector.extract_strided_slice %336 {offsets = [0, 96], sizes = [2, 32], strides = [1, 1]} : vector<2x128xf32> to vector<2x32xf32>
    %356 = math.tanh %355 : vector<2x32xf32>
    %357 = arith.mulf %332, %348 : vector<2x32xf32>
    %358 = arith.mulf %342, %356 : vector<2x32xf32>
    %359 = arith.addf %357, %358 : vector<2x32xf32>
    %360 = math.tanh %359 : vector<2x32xf32>
    %361 = arith.mulf %354, %360 : vector<2x32xf32>
    %362 = arith.index_cast %c6_i32 : i32 to index
    %c0_95 = arith.constant 0 : index
    %c0_96 = arith.constant 0 : index
    %363 = vector.load %arg9[%362, %c0_95, %c0_96] : memref<8x2x32xf32, #tpu.memory_space<vmem>>, vector<1x2x32xf32>
    %364 = vector.shape_cast %363 : vector<1x2x32xf32> to vector<2x32xf32>
    %365 = vector.shape_cast %361 : vector<2x32xf32> to vector<1x2x32xf32>
    tpu.vector_store %arg9[%362, %c0_95, %c0_96], %365 {strides = array<i32>} : memref<8x2x32xf32, #tpu.memory_space<vmem>>, vector<1x2x32xf32>,
    %366 = arith.index_cast %c6_i32 : i32 to index
    %c0_97 = arith.constant 0 : index
    %c0_98 = arith.constant 0 : index
    %367 = vector.load %arg10[%366, %c0_97, %c0_98] : memref<8x2x32xf32, #tpu.memory_space<vmem>>, vector<1x2x32xf32>
    %368 = vector.shape_cast %367 : vector<1x2x32xf32> to vector<2x32xf32>
    %369 = vector.shape_cast %359 : vector<2x32xf32> to vector<1x2x32xf32>
    tpu.vector_store %arg10[%366, %c0_97, %c0_98], %369 {strides = array<i32>} : memref<8x2x32xf32, #tpu.memory_space<vmem>>, vector<1x2x32xf32>,
    %c7_i32 = arith.constant 7 : i32
    %370 = arith.index_cast %c7_i32 : i32 to index
    %c0_99 = arith.constant 0 : index
    %c0_100 = arith.constant 0 : index
    %371 = vector.load %arg1[%370, %c0_99, %c0_100] : memref<8x2x128xf32, #tpu.memory_space<vmem>>, vector<1x2x128xf32>
    %372 = vector.shape_cast %371 : vector<1x2x128xf32> to vector<2x128xf32>
    %373 = arith.index_cast %c7_i32 : i32 to index
    %c0_101 = arith.constant 0 : index
    %c0_102 = arith.constant 0 : index
    %374 = vector.load %arg2[%373, %c0_101, %c0_102] : memref<8x2x1xf32, #tpu.memory_space<vmem>>, vector<1x2x1xf32>
    %375 = vector.shape_cast %374 : vector<1x2x1xf32> to vector<2x1xf32>
    %376 = tpu.reciprocal %375 {approx = true} : vector<2x1xf32> -> vector<2x1xf32>
    %cst_103 = arith.constant dense<0.000000e+00> : vector<2x32xf32>
    %377 = tpu.matmul %359, %2, %cst_103 {dimension_numbers = #tpu.dot_dimension_numbers<[1], [0], [0], [1], [0, 0, 1, 1], [], []>} : vector<2x32xf32>, vector<32x32xf32>, vector<2x32xf32> -> vector<2x32xf32>
    %378 = vector.broadcast %3 : vector<1x32xf32> to vector<2x32xf32>
    %379 = arith.addf %377, %378 : vector<2x32xf32>
    %380 = math.tanh %379 : vector<2x32xf32>
    %381 = arith.subf %359, %380 : vector<2x32xf32>
    %382 = vector.broadcast %376 : vector<2x1xf32> to vector<2x32xf32>
    %383 = arith.mulf %380, %382 : vector<2x32xf32>
    %384 = arith.addf %381, %383 : vector<2x32xf32>
    %cst_104 = arith.constant dense<0.000000e+00> : vector<2x128xf32>
    %385 = tpu.matmul %361, %0, %cst_104 {dimension_numbers = #tpu.dot_dimension_numbers<[1], [0], [0], [1], [0, 0, 1, 1], [], []>} : vector<2x32xf32>, vector<32x128xf32>, vector<2x128xf32> -> vector<2x128xf32>
    %386 = arith.addf %372, %385 : vector<2x128xf32>
    %387 = vector.broadcast %1 : vector<1x128xf32> to vector<2x128xf32>
    %388 = arith.addf %386, %387 : vector<2x128xf32>
    %389 = vector.extract_strided_slice %388 {offsets = [0, 0], sizes = [2, 32], strides = [1, 1]} : vector<2x128xf32> to vector<2x32xf32>
    %390 = arith.negf %389 : vector<2x32xf32>
    %391 = math.exp %390 : vector<2x32xf32>
    %cst_105 = arith.constant 1.000000e+00 : f32
    %392 = vector.broadcast %cst_105 : f32 to vector<2x32xf32>
    %393 = arith.addf %392, %391 : vector<2x32xf32>
    %394 = arith.divf %392, %393 : vector<2x32xf32>
    %395 = vector.extract_strided_slice %388 {offsets = [0, 32], sizes = [2, 32], strides = [1, 1]} : vector<2x128xf32> to vector<2x32xf32>
    %396 = arith.negf %395 : vector<2x32xf32>
    %397 = math.exp %396 : vector<2x32xf32>
    %cst_106 = arith.constant 1.000000e+00 : f32
    %398 = vector.broadcast %cst_106 : f32 to vector<2x32xf32>
    %399 = arith.addf %398, %397 : vector<2x32xf32>
    %400 = arith.divf %398, %399 : vector<2x32xf32>
    %401 = vector.extract_strided_slice %388 {offsets = [0, 64], sizes = [2, 32], strides = [1, 1]} : vector<2x128xf32> to vector<2x32xf32>
    %402 = arith.negf %401 : vector<2x32xf32>
    %403 = math.exp %402 : vector<2x32xf32>
    %cst_107 = arith.constant 1.000000e+00 : f32
    %404 = vector.broadcast %cst_107 : f32 to vector<2x32xf32>
    %405 = arith.addf %404, %403 : vector<2x32xf32>
    %406 = arith.divf %404, %405 : vector<2x32xf32>
    %407 = vector.extract_strided_slice %388 {offsets = [0, 96], sizes = [2, 32], strides = [1, 1]} : vector<2x128xf32> to vector<2x32xf32>
    %408 = math.tanh %407 : vector<2x32xf32>
    %409 = arith.mulf %384, %400 : vector<2x32xf32>
    %410 = arith.mulf %394, %408 : vector<2x32xf32>
    %411 = arith.addf %409, %410 : vector<2x32xf32>
    %412 = math.tanh %411 : vector<2x32xf32>
    %413 = arith.mulf %406, %412 : vector<2x32xf32>
    %414 = arith.index_cast %c7_i32 : i32 to index
    %c0_108 = arith.constant 0 : index
    %c0_109 = arith.constant 0 : index
    %415 = vector.load %arg9[%414, %c0_108, %c0_109] : memref<8x2x32xf32, #tpu.memory_space<vmem>>, vector<1x2x32xf32>
    %416 = vector.shape_cast %415 : vector<1x2x32xf32> to vector<2x32xf32>
    %417 = vector.shape_cast %413 : vector<2x32xf32> to vector<1x2x32xf32>
    tpu.vector_store %arg9[%414, %c0_108, %c0_109], %417 {strides = array<i32>} : memref<8x2x32xf32, #tpu.memory_space<vmem>>, vector<1x2x32xf32>,
    %418 = arith.index_cast %c7_i32 : i32 to index
    %c0_110 = arith.constant 0 : index
    %c0_111 = arith.constant 0 : index
    %419 = vector.load %arg10[%418, %c0_110, %c0_111] : memref<8x2x32xf32, #tpu.memory_space<vmem>>, vector<1x2x32xf32>
    %420 = vector.shape_cast %419 : vector<1x2x32xf32> to vector<2x32xf32>
    %421 = vector.shape_cast %411 : vector<2x32xf32> to vector<1x2x32xf32>
    tpu.vector_store %arg10[%418, %c0_110, %c0_111], %421 {strides = array<i32>} : memref<8x2x32xf32, #tpu.memory_space<vmem>>, vector<1x2x32xf32>,
    %c8_i32 = arith.constant 8 : i32
    %c0_112 = arith.constant 0 : index
    %c0_113 = arith.constant 0 : index
    %c0_114 = arith.constant 0 : index
    %422 = vector.load %arg9[%c0_112, %c0_113, %c0_114] : memref<8x2x32xf32, #tpu.memory_space<vmem>>, vector<8x2x32xf32>
    %c0_115 = arith.constant 0 : index
    %c0_116 = arith.constant 0 : index
    %c0_117 = arith.constant 0 : index
    %423 = vector.load %arg3[%c0_115, %c0_116, %c0_117] : memref<8x2x1xf32, #tpu.memory_space<vmem>>, vector<8x2x1xf32>
    %c0_118 = arith.constant 0 : index
    %c0_119 = arith.constant 0 : index
    %424 = vector.load %arg8[%c0_118, %c0_119] : memref<32x4xf32, #tpu.memory_space<vmem>>, vector<32x4xf32>
    %cst_120 = arith.constant 0.000000e+00 : f32
    %425 = vector.broadcast %cst_120 : f32 to vector<1x1xf32>
    %426 = vector.extract_strided_slice %422 {offsets = [0, 0, 0], sizes = [8, 1, 32], strides = [1, 1, 1]} : vector<8x2x32xf32> to vector<8x1x32xf32>
    %427 = vector.shape_cast %426 : vector<8x1x32xf32> to vector<8x32xf32>
    %cst_121 = arith.constant dense<0.000000e+00> : vector<8x4xf32>
    %428 = tpu.matmul %427, %424, %cst_121 {dimension_numbers = #tpu.dot_dimension_numbers<[1], [0], [0], [1], [0, 0, 1, 1], [], []>} : vector<8x32xf32>, vector<32x4xf32>, vector<8x4xf32> -> vector<8x4xf32>
    %cst_122 = arith.constant 1.000000e+00 : f32
    %429 = vector.broadcast %cst_122 : f32 to vector<8x4xf32>
    %430 = arith.mulf %428, %429 : vector<8x4xf32>
    %cst_123 = arith.constant dense<0xFF800000> : vector<4xf32>
    %431 = vector.multi_reduction <maximumf>, %430, %cst_123 [0] : vector<8x4xf32> to vector<4xf32>
    %432 = vector.shape_cast %431 : vector<4xf32> to vector<1x4xf32>
    %433 = vector.broadcast %432 : vector<1x4xf32> to vector<8x4xf32>
    %434 = arith.subf %430, %433 : vector<8x4xf32>
    %435 = math.exp %434 : vector<8x4xf32>
    %cst_124 = arith.constant dense<0.000000e+00> : vector<4xf32>
    %436 = vector.multi_reduction <add>, %435, %cst_124 [0] : vector<8x4xf32> to vector<4xf32>
    %437 = vector.shape_cast %436 : vector<4xf32> to vector<1x4xf32>
    %438 = tpu.reciprocal %437 {approx = true} : vector<1x4xf32> -> vector<1x4xf32>
    %439 = vector.broadcast %438 : vector<1x4xf32> to vector<8x4xf32>
    %440 = arith.mulf %435, %439 : vector<8x4xf32>
    %441 = vector.extract_strided_slice %423 {offsets = [0, 0, 0], sizes = [8, 1, 1], strides = [1, 1, 1]} : vector<8x2x1xf32> to vector<8x1x1xf32>
    %442 = vector.shape_cast %441 : vector<8x1x1xf32> to vector<8x1xf32>
    %443 = vector.broadcast %442 : vector<8x1xf32> to vector<8x4xf32>
    %444 = arith.mulf %440, %443 : vector<8x4xf32>
    %445 = vector.shape_cast %444 : vector<8x4xf32> to vector<1x8x4xf32>
    %cst_125 = arith.constant dense<0.000000e+00> : vector<1xf32>
    %446 = vector.multi_reduction <add>, %445, %cst_125 [1, 2] : vector<1x8x4xf32> to vector<1xf32>
    %447 = vector.shape_cast %446 : vector<1xf32> to vector<1x1x1xf32>
    %448 = vector.extract %447[0, 0, 0] : f32 from vector<1x1x1xf32>
    %449 = vector.broadcast %448 : f32 to vector<1x1xf32>
    %450 = arith.addf %425, %449 : vector<1x1xf32>
    %451 = vector.extract_strided_slice %422 {offsets = [0, 1, 0], sizes = [8, 1, 32], strides = [1, 1, 1]} : vector<8x2x32xf32> to vector<8x1x32xf32>
    %452 = vector.shape_cast %451 : vector<8x1x32xf32> to vector<8x32xf32>
    %cst_126 = arith.constant dense<0.000000e+00> : vector<8x4xf32>
    %453 = tpu.matmul %452, %424, %cst_126 {dimension_numbers = #tpu.dot_dimension_numbers<[1], [0], [0], [1], [0, 0, 1, 1], [], []>} : vector<8x32xf32>, vector<32x4xf32>, vector<8x4xf32> -> vector<8x4xf32>
    %cst_127 = arith.constant 1.000000e+00 : f32
    %454 = vector.broadcast %cst_127 : f32 to vector<8x4xf32>
    %455 = arith.mulf %453, %454 : vector<8x4xf32>
    %cst_128 = arith.constant dense<0xFF800000> : vector<4xf32>
    %456 = vector.multi_reduction <maximumf>, %455, %cst_128 [0] : vector<8x4xf32> to vector<4xf32>
    %457 = vector.shape_cast %456 : vector<4xf32> to vector<1x4xf32>
    %458 = vector.broadcast %457 : vector<1x4xf32> to vector<8x4xf32>
    %459 = arith.subf %455, %458 : vector<8x4xf32>
    %460 = math.exp %459 : vector<8x4xf32>
    %cst_129 = arith.constant dense<0.000000e+00> : vector<4xf32>
    %461 = vector.multi_reduction <add>, %460, %cst_129 [0] : vector<8x4xf32> to vector<4xf32>
    %462 = vector.shape_cast %461 : vector<4xf32> to vector<1x4xf32>
    %463 = tpu.reciprocal %462 {approx = true} : vector<1x4xf32> -> vector<1x4xf32>
    %464 = vector.broadcast %463 : vector<1x4xf32> to vector<8x4xf32>
    %465 = arith.mulf %460, %464 : vector<8x4xf32>
    %466 = vector.extract_strided_slice %423 {offsets = [0, 1, 0], sizes = [8, 1, 1], strides = [1, 1, 1]} : vector<8x2x1xf32> to vector<8x1x1xf32>
    %467 = vector.shape_cast %466 : vector<8x1x1xf32> to vector<8x1xf32>
    %468 = vector.broadcast %467 : vector<8x1xf32> to vector<8x4xf32>
    %469 = arith.mulf %465, %468 : vector<8x4xf32>
    %470 = vector.shape_cast %469 : vector<8x4xf32> to vector<1x8x4xf32>
    %cst_130 = arith.constant dense<0.000000e+00> : vector<1xf32>
    %471 = vector.multi_reduction <add>, %470, %cst_130 [1, 2] : vector<1x8x4xf32> to vector<1xf32>
    %472 = vector.shape_cast %471 : vector<1xf32> to vector<1x1x1xf32>
    %473 = vector.extract %472[0, 0, 0] : f32 from vector<1x1x1xf32>
    %474 = vector.broadcast %473 : f32 to vector<1x1xf32>
    %475 = arith.addf %450, %474 : vector<1x1xf32>
    %476 = tpu.reciprocal %475 {approx = true} : vector<1x1xf32> -> vector<1x1xf32>
    %477 = vector.broadcast %476 : vector<1x1xf32> to vector<8x4xf32>
    %478 = arith.mulf %444, %477 : vector<8x4xf32>
    %479 = vector.extract_strided_slice %422 {offsets = [0, 0, 0], sizes = [8, 1, 32], strides = [1, 1, 1]} : vector<8x2x32xf32> to vector<8x1x32xf32>
    %480 = vector.shape_cast %479 : vector<8x1x32xf32> to vector<8x32xf32>
    %cst_131 = arith.constant dense<0.000000e+00> : vector<4x32xf32>
    %481 = tpu.matmul %478, %480, %cst_131 {dimension_numbers = #tpu.dot_dimension_numbers<[0], [0], [1], [1], [0, 1, 1, 1], [], []>} : vector<8x4xf32>, vector<8x32xf32>, vector<4x32xf32> -> vector<4x32xf32>
    %c0_132 = arith.constant 0 : index
    %c0_133 = arith.constant 0 : index
    %c0_134 = arith.constant 0 : index
    %482 = vector.load %arg11[%c0_132, %c0_133, %c0_134] : memref<2x4x32xf32, #tpu.memory_space<vmem>>, vector<1x4x32xf32>
    %483 = vector.shape_cast %482 : vector<1x4x32xf32> to vector<4x32xf32>
    %484 = vector.shape_cast %481 : vector<4x32xf32> to vector<1x4x32xf32>
    tpu.vector_store %arg11[%c0_132, %c0_133, %c0_134], %484 {strides = array<i32>} : memref<2x4x32xf32, #tpu.memory_space<vmem>>, vector<1x4x32xf32>,
    %485 = vector.broadcast %476 : vector<1x1xf32> to vector<8x4xf32>
    %486 = arith.mulf %469, %485 : vector<8x4xf32>
    %487 = vector.extract_strided_slice %422 {offsets = [0, 1, 0], sizes = [8, 1, 32], strides = [1, 1, 1]} : vector<8x2x32xf32> to vector<8x1x32xf32>
    %488 = vector.shape_cast %487 : vector<8x1x32xf32> to vector<8x32xf32>
    %cst_135 = arith.constant dense<0.000000e+00> : vector<4x32xf32>
    %489 = tpu.matmul %486, %488, %cst_135 {dimension_numbers = #tpu.dot_dimension_numbers<[0], [0], [1], [1], [0, 1, 1, 1], [], []>} : vector<8x4xf32>, vector<8x32xf32>, vector<4x32xf32> -> vector<4x32xf32>
    %c1 = arith.constant 1 : index
    %c0_136 = arith.constant 0 : index
    %c0_137 = arith.constant 0 : index
    %490 = vector.load %arg11[%c1, %c0_136, %c0_137] : memref<2x4x32xf32, #tpu.memory_space<vmem>>, vector<1x4x32xf32>
    %491 = vector.shape_cast %490 : vector<1x4x32xf32> to vector<4x32xf32>
    %492 = vector.shape_cast %489 : vector<4x32xf32> to vector<1x4x32xf32>
    tpu.vector_store %arg11[%c1, %c0_136, %c0_137], %492 {strides = array<i32>} : memref<2x4x32xf32, #tpu.memory_space<vmem>>, vector<1x4x32xf32>,
    return
  }
  func.func @transform_0(%arg0: i32) -> (i32, i32, i32) {
    %c0_i32 = arith.constant 0 : i32
    %c0_i32_0 = arith.constant 0 : i32
    %c0_i32_1 = arith.constant 0 : i32
    %c0_i32_2 = arith.constant 0 : i32
    return %c0_i32, %c0_i32_0, %c0_i32_1 : i32, i32, i32
  }
  func.func @transform_1(%arg0: i32) -> (i32, i32, i32) {
    %c0_i32 = arith.constant 0 : i32
    %c0_i32_0 = arith.constant 0 : i32
    %c0_i32_1 = arith.constant 0 : i32
    %c0_i32_2 = arith.constant 0 : i32
    return %c0_i32, %c0_i32_0, %c0_i32_1 : i32, i32, i32
  }
  func.func @transform_2(%arg0: i32) -> (i32, i32, i32) {
    %c0_i32 = arith.constant 0 : i32
    %c0_i32_0 = arith.constant 0 : i32
    %c0_i32_1 = arith.constant 0 : i32
    %c0_i32_2 = arith.constant 0 : i32
    return %c0_i32, %c0_i32_0, %c0_i32_1 : i32, i32, i32
  }
  func.func @transform_3(%arg0: i32) -> (i32, i32) {
    %c0_i32 = arith.constant 0 : i32
    %c0_i32_0 = arith.constant 0 : i32
    %c0_i32_1 = arith.constant 0 : i32
    return %c0_i32, %c0_i32_0 : i32, i32
  }
  func.func @transform_4(%arg0: i32) -> (i32, i32) {
    %c0_i32 = arith.constant 0 : i32
    %c0_i32_0 = arith.constant 0 : i32
    %c0_i32_1 = arith.constant 0 : i32
    return %c0_i32, %c0_i32_0 : i32, i32
  }
  func.func @transform_5(%arg0: i32) -> (i32, i32) {
    %c0_i32 = arith.constant 0 : i32
    %c0_i32_0 = arith.constant 0 : i32
    %c0_i32_1 = arith.constant 0 : i32
    return %c0_i32, %c0_i32_0 : i32, i32
  }
  func.func @transform_6(%arg0: i32) -> (i32, i32) {
    %c0_i32 = arith.constant 0 : i32
    %c0_i32_0 = arith.constant 0 : i32
    %c0_i32_1 = arith.constant 0 : i32
    return %c0_i32, %c0_i32_0 : i32, i32
  }
  func.func @transform_7(%arg0: i32) -> (i32, i32) {
    %c0_i32 = arith.constant 0 : i32
    %c0_i32_0 = arith.constant 0 : i32
    %c0_i32_1 = arith.constant 0 : i32
    return %c0_i32, %c0_i32_0 : i32, i32
  }
  func.func @transform_8(%arg0: i32) -> (i32, i32, i32) {
    %c0_i32 = arith.constant 0 : i32
    %c0_i32_0 = arith.constant 0 : i32
    %c0_i32_1 = arith.constant 0 : i32
    %c0_i32_2 = arith.constant 0 : i32
    return %c0_i32, %c0_i32_0, %c0_i32_1 : i32, i32, i32
  }
  func.func @transform_9(%arg0: i32) -> (i32, i32, i32) {
    %c0_i32 = arith.constant 0 : i32
    %c0_i32_0 = arith.constant 0 : i32
    %c0_i32_1 = arith.constant 0 : i32
    %c0_i32_2 = arith.constant 0 : i32
    return %c0_i32, %c0_i32_0, %c0_i32_1 : i32, i32, i32
  }
  func.func @transform_10(%arg0: i32) -> (i32, i32, i32) {
    %c0_i32 = arith.constant 0 : i32
    %c0_i32_0 = arith.constant 0 : i32
    %c0_i32_1 = arith.constant 0 : i32
    %c0_i32_2 = arith.constant 0 : i32
    return %c0_i32, %c0_i32_0, %c0_i32_1 : i32, i32, i32
  }
}

</mosaic_0001>

<bundles_post_ra>
// kernel: memory_encoder_forward.1
= control target key start
LH: loop header
LB: loop body
LE: loop exit
PB: predicated region body
PF: predicated region fallthrough
CT: control target
= control target key end

     0   :  { %s1932_s0 = inlined_call_operand.vmem [shape: f32[8,2,128], index: 0, kind: input, shape index: {}]   ;;  %s1933_s1 = inlined_call_operand.vmem [shape: f32[8,2,1], index: 1, kind: input, shape index: {}]   ;;  %s1934_s2 = inlined_call_operand.vmem [shape: f32[8,2,1], index: 2, kind: input, shape index: {}]   ;;  %s1935_s3 = inlined_call_operand.vmem [shape: f32[32,128], index: 3, kind: input, shape index: {}]   ;;  %s1936_s4 = inlined_call_operand.vmem [shape: f32[1,128], index: 4, kind: input, shape index: {}]   ;;  %s1937_s5 = inlined_call_operand.vmem [shape: f32[32,32], index: 5, kind: input, shape index: {}]   ;;  %s1938_s6 = inlined_call_operand.vmem [shape: f32[1,32], index: 6, kind: input, shape index: {}]   ;;  %s1939_s7 = inlined_call_operand.vmem [shape: f32[32,4], index: 7, kind: input, shape index: {}]   ;;  %s1940_s8 = inlined_call_operand.vmem [shape: f32[8,2,32], index: 8, kind: output, shape index: {0}]   ;;  %s1941_s9 = inlined_call_operand.vmem [shape: f32[8,2,32], index: 9, kind: output, shape index: {1}]   ;;  %s1942_s10 = inlined_call_operand.hbm [shape: f32[2,4,32], index: 10, kind: output, shape index: {2}]  }
   0x1   :  { %v1540_v0 = vld [vmem:[%s1935_s3 + $0x18] sm:$0xff]  ;;  %v1545_v1 = vld [vmem:[%s1935_s3 + $0x10] sm:$0xff]  ;;  %v1562_v4 = vld [vmem:[%s1935_s3 + $0x8] sm:$0xff] }
   0x2   :  { %94 = vmatpush.msra.mxu1 %v1540_v0  ;;  %v1551_v2 = vld [vmem:[%s1937_s5 + $0x18] sm:$0xff]  ;;  %v1556_v3 = vld [vmem:[%s1937_s5 + $0x10] sm:$0xff]  ;;  %202 = vmatpush.msra.mxu3 %v1540_v0 }
   0x3   :  { %65 = vmatpush.msra.mxu0 %v1551_v2  ;;  %171 = vmatpush.msra.mxu2 %v1551_v2 }
   0x4   :  { %95 = vmatpush.msra.mxu1 %v1545_v1  ;;  %203 = vmatpush.msra.mxu3 %v1545_v1 }
   0x5   :  { %16 = vsyncpa [#allocation3], 0  ;;  %v1571_v5 = vld [vmem:[%s1935_s3] sm:$0xff]  ;;  %66 = vmatpush.msra.mxu0 %v1556_v3  ;;  %172 = vmatpush.msra.mxu2 %v1556_v3  ;;  %v1475_v6 = vmov 0.0   ;;  %v1594_v7 = vld [vmem:[%s1937_s5 + $0x8] sm:$0xff]  ;;  %v1476_v10 = vmov 0  }
   0x6   :  { %96 = vmatpush.msra.mxu1 %v1562_v4  ;;  %204 = vmatpush.msra.mxu3 %v1562_v4  ;;  %v1601_v8 = vld [vmem:[%s1937_s5] sm:$0xff]  ;;  %s1477_s13 = smov 32   ;;  %vm148_vm4 = vcmask 254976   ;;  %vm49_vm5 = vcmask 261120   ;;  %s1479_s17 = smov 64  }
   0x7   :  { %67 = vmatpush.msra.mxu0 %v1594_v7  ;;  %173 = vmatpush.msra.mxu2 %v1594_v7  ;;  %v44_v9 = vld [vmem:[%s1933_s1] sm:$0x3]  ;;  %v1275_v45 = vld [vmem:[%s1933_s1 + $0x2] sm:$0x3]  ;;  %s1480_s21 = smov [#allocation2]   ;;  %s1257_s24 = sshll.u32 %s1942_s10, 4  ;;  %s1258_s24 = int_to_ptr.hbm [resolvable:$true] %s1257_s24 }
   0x8   :  { %97 = vmatpush.msra.mxu1 %v1571_v5  ;;  %205 = vmatpush.msra.mxu3 %v1571_v5  ;;  %1343 = vrcp.f32 %v44_v9  ;;  %v43_v12 = vld [vmem:[%s1932_s0] sm:$0x3]  ;;  %v1274_v50 = vld [vmem:[%s1932_s0 + $0x2] sm:$0x3]  ;;  %s1255_s22 = sshll.u32 %s1480_s21, 4  ;;  %s1481_s3 = smov 4   ;;  %s1256_s22 = int_to_ptr.vmem [resolvable:$true] %s1255_s22 }
   0x9   :  { %98 = vmatmul.f32.vlgmr.msra.gmra.mxu1 %v1475_v6  ;;  %68 = vmatpush.msra.mxu0 %v1601_v8  ;;  %v1626_v13 = vld [vmem:[%s1936_s4] ss:$0 sm:$0xff]  ;;  %s1478_s4 = smov 96  }
   0xa   :  { %414 = vmatpush.msrb.mxu3 %v1540_v0  ;;  %308 = vmatpush.msrb.mxu1 %v1540_v0  ;;  %v1634_v31 = vld [vmem:[%s1938_s6] ss:$0 sm:$0xff] }
   0xb   :  { %174 = vmatpush.msra.mxu2 %v1601_v8  ;;  %69 = vmatmul.f32.vlgmr.msra.gmra.mxu0 %v1475_v6 }
   0xc   :  { %415 = vmatpush.msrb.mxu3 %v1545_v1  ;;  %309 = vmatpush.msrb.mxu1 %v1545_v1 }
   0xd   :  { %383 = vmatpush.msrb.mxu2 %v1551_v2  ;;  %277 = vmatpush.msrb.mxu0 %v1551_v2 }
   0xe   :  { %416 = vmatpush.msrb.mxu3 %v1562_v4  ;;  %310 = vmatpush.msrb.mxu1 %v1562_v4  ;;  %v1344_v11 = vpop.eup %1343 }
   0xf   :  { %384 = vmatpush.msrb.mxu2 %v1556_v3  ;;  %278 = vmatpush.msrb.mxu0 %v1556_v3 }
  0x10   :  { %417 = vmatpush.msrb.mxu3 %v1571_v5  ;;  %311 = vmatpush.msrb.mxu1 %v1571_v5 }
  0x11   :  { %385 = vmatpush.msrb.mxu2 %v1594_v7  ;;  %279 = vmatpush.msrb.mxu0 %v1594_v7 }
  0x12   :  { %520 = vmatpush.msra.mxu1 %v1540_v0  ;;  %1338 = vset.pattern.permute.xlu0 %v1476_v10 }
  0x13   :  { %386 = vmatpush.msrb.mxu2 %v1601_v8  ;;  %280 = vmatpush.msrb.mxu0 %v1601_v8 }
  0x14   :  { %521 = vmatpush.msra.mxu1 %v1545_v1  ;;  %1339 = vset.pattern.permute.xlu2 %v1476_v10 }
  0x15   :  { %489 = vmatpush.msra.mxu0 %v1551_v2  ;;  %1340 = vset.pattern.permute.xlu1 %v1476_v10 }
  0x16   :  { %522 = vmatpush.msra.mxu1 %v1562_v4  ;;  %77 = vperm.xlu0 %1338, %v1344_v11  }
  0x17   :  { %490 = vmatpush.msra.mxu0 %v1556_v3 }
  0x18   :  { %523 = vmatpush.msra.mxu1 %v1571_v5 }
  0x19   :  { %491 = vmatpush.msra.mxu0 %v1594_v7 }
  0x1b   :  { %492 = vmatpush.msra.mxu0 %v1601_v8 }
  0x86   :  { %v99_v14 = vpop.f32.mrf.mxu1 }
  0x87   :  { %v102_v15 = vadd.f32 %v99_v14, %v43_v12  ;;  %v1282_v12 = vld [vmem:[%s1933_s1 + $0x4] sm:$0x3] }
  0x88   :  { %v70_v32 = vpop.f32.mrf.mxu0  ;;  %v78_v34 = vpop.permute.xlu0 %77 }
  0x89   :  { %v106_v16 = vadd.f32 %v1626_v13, %v102_v15  ;;  %v71_v33 = vadd.f32 %v1634_v31, %v70_v32  ;;  %v1281_v32 = vld [vmem:[%s1932_s0 + $0x4] sm:$0x3] }
  0x8b   :  { %v1273_v17 = vmul.f32 -1.442695, %v106_v16  ;;  %1345 = vtanh.f32 %v106_v16 }
  0x8d   :  { %1347 = vpow2.f32 %v1273_v17 }
  0x91   :  { %v1346_v18 = vpop.eup %1345 }
  0x92   :  { %133 = vrot.lane.b32.xlu1 %v1346_v18, %s1477_s13 }
  0x93   :  { %v1348_v19 = vpop.eup %1347 }
  0x94   :  { %v110_v20 = vadd.f32 1.0, %v1348_v19 }
  0x96   :  { %1349 = vrcp.f32 %v110_v20  ;;  %v122_v24 = vand.u32 2147483648, %v110_v20  ;;  %v120_v26 = vand.u32 2147483647, %v110_v20  ;;  %vm116_vm1 = vweird.f32 %v110_v20 }
  0x97   :  { %1351 = vtanh.f32 %v71_v33 }
  0x98   :  { %v123_v28 = vor.u32 1.1754944e-38, %v122_v24  ;;  %vm121_vm3 = vcmp.eq.f32.partialorder %v120_v26, 8.507059e+37 }
  0x9c   :  { %v1350_v21 = vpop.eup %1349 }
  0x9d   :  { %v112_v22 = vmul.f32 %v1350_v21, %v110_v20  ;;  %vm117_vm0 = vweird.f32 %v1350_v21  ;;  %v1352_v35 = vpop.eup %1351 }
  0x9e   :  { %vm118_vm2 = vmor %vm116_vm1, %vm117_vm0  ;;  %v80_v36 = vmul.f32 %v1352_v35, %v78_v34  ;;  %v74_v37 = vsub.f32 0.0, %v1352_v35 }
  0x9f   :  { %v113_v23 = vsub.f32 1.0, %v112_v22 }
  0xa0   :  { %v81_v39 = vadd.f32 %v80_v36, %v74_v37  ;;  %v1289_v37 = vld [vmem:[%s1933_s1 + $0x6] sm:$0x3] }
  0xa1   :  { %v114_v25 = vmul.f32 %v1350_v21, %v113_v23 }
  0xa3   :  { %v115_v27 = vadd.f32 %v1350_v21, %v114_v25 }
  0xa5   :  { %v119_v29 = vsel %vm118_vm2, %v1350_v21, %v115_v27 }
  0xa6   :  { %v124_v30 = vsel %vm121_vm3, %v123_v28, %v119_v29 }
  0xa7   :  { %128 = vrot.lane.b32.xlu0 %v124_v30, %s1478_s4 }
 0x104   :  { %v134_v38 = vpop.permute.xlu1 %133 }
 0x105   :  { %v136_v41 = vmul.f32 %v134_v38, %v124_v30 }
 0x119   :  { %v129_v40 = vpop.permute.xlu0 %128 }
 0x11a   :  { %v131_v42 = vmul.f32 %v129_v40, %v81_v39 }
 0x11c   :  { %v1637_v43 = vadd.f32 %v136_v41, %v131_v42 }
 0x11e   :  { %1353 = vtanh.f32 %v1637_v43  ;;  %150 = vst.msk [vmem:[%s1941_s9] sm:$0x3] %vm148_vm4, %v1637_v43  ;;  %1276 = vmatmul.msk.f32.vlgmr.msra.gmra.mxu2 %vm49_vm5, %v1637_v43 }
 0x11f   :  { %595 = vmatpush.msra.mxu2 %v1551_v2  ;;  %1355 = vrcp.f32 %v1275_v45 }
 0x121   :  { %596 = vmatpush.msra.mxu2 %v1556_v3 }
 0x123   :  { %597 = vmatpush.msra.mxu2 %v1594_v7 }
 0x124   :  { %v1354_v44 = vpop.eup %1353 }
 0x125   :  { %140 = vrot.lane.b32.xlu1 %v1354_v44, %s1479_s17  ;;  %598 = vmatpush.msra.mxu2 %v1601_v8  ;;  %v1356_v48 = vpop.eup %1355 }
 0x197   :  { %v141_v46 = vpop.permute.xlu1 %140 }
 0x198   :  { %v143_v47 = vmul.f32 %v141_v46, %v124_v30 }
 0x19a   :  { %145 = vrot.lane.b32.xlu2 %v143_v47, %s1479_s17 }
 0x1a1   :  { %v176_v14 = vpop.f32.mrf.mxu2 }
 0x1a2   :  { %183 = vperm.xlu2 %1339, %v1356_v48   ;;  %v177_v15 = vadd.f32 %v1634_v31, %v176_v14 }
 0x1f4   :  { %v146_v49 = vpop.permute.xlu2 %145 }
 0x1f5   :  { %149 = vst.msk [vmem:[%s1940_s8] sm:$0x3] %vm148_vm4, %v146_v49  ;;  %1277 = vmatmul.msk.f32.vlgmr.msra.gmra.mxu3 %vm49_vm5, %v146_v49 }
 0x1f6   :  { %626 = vmatpush.msra.mxu3 %v1540_v0 }
 0x1f8   :  { %627 = vmatpush.msra.mxu3 %v1545_v1 }
 0x1fa   :  { %628 = vmatpush.msra.mxu3 %v1562_v4 }
 0x1fc   :  { %629 = vmatpush.msra.mxu3 %v1571_v5  ;;  %v184_v17 = vpop.permute.xlu2 %183 }
 0x278   :  { %v207_v51 = vpop.f32.mrf.mxu3 }
 0x279   :  { %v210_v52 = vadd.f32 %v1274_v50, %v207_v51 }
 0x27b   :  { %v211_v53 = vadd.f32 %v1626_v13, %v210_v52 }
 0x27d   :  { %v1278_v54 = vmul.f32 -1.442695, %v211_v53  ;;  %1357 = vtanh.f32 %v211_v53 }
 0x27f   :  { %1359 = vpow2.f32 %v1278_v54 }
 0x283   :  { %v1358_v55 = vpop.eup %1357 }
 0x284   :  { %238 = vrot.lane.b32.xlu1 %v1358_v55, %s1477_s13 }
 0x285   :  { %v1360_v56 = vpop.eup %1359 }
 0x286   :  { %v215_v57 = vadd.f32 1.0, %v1360_v56 }
 0x288   :  { %1361 = vrcp.f32 %v215_v57  ;;  %v227_v61 = vand.u32 2147483648, %v215_v57  ;;  %v225_v63 = vand.u32 2147483647, %v215_v57  ;;  %vm221_vm7 = vweird.f32 %v215_v57 }
 0x289   :  { %1363 = vrcp.f32 %v1282_v12 }
 0x28a   :  { %v228_v9 = vor.u32 1.1754944e-38, %v227_v61  ;;  %vm226_vm9 = vcmp.eq.f32.partialorder %v225_v63, 8.507059e+37  ;;  %1365 = vtanh.f32 %v177_v15 }
 0x28e   :  { %v1362_v58 = vpop.eup %1361 }
 0x28f   :  { %v217_v59 = vmul.f32 %v1362_v58, %v215_v57  ;;  %vm222_vm6 = vweird.f32 %v1362_v58  ;;  %v1364_v16 = vpop.eup %1363 }
 0x290   :  { %vm223_vm8 = vmor %vm221_vm7, %vm222_vm6  ;;  %289 = vperm.xlu1 %1340, %v1364_v16   ;;  %v1366_v18 = vpop.eup %1365 }
 0x291   :  { %v218_v60 = vsub.f32 1.0, %v217_v59  ;;  %v186_v19 = vmul.f32 %v1366_v18, %v184_v17  ;;  %v180_v20 = vsub.f32 %v1637_v43, %v1366_v18 }
 0x293   :  { %v219_v62 = vmul.f32 %v1362_v58, %v218_v60  ;;  %v187_v22 = vadd.f32 %v186_v19, %v180_v20 }
 0x295   :  { %v220_v6 = vadd.f32 %v1362_v58, %v219_v62 }
 0x297   :  { %v224_v10 = vsel %vm223_vm8, %v1362_v58, %v220_v6 }
 0x298   :  { %v229_v11 = vsel %vm226_vm9, %v228_v9, %v224_v10 }
 0x299   :  { %233 = vrot.lane.b32.xlu0 %v229_v11, %s1478_s4 }
 0x2f6   :  { %v239_v21 = vpop.permute.xlu1 %238 }
 0x2f7   :  { %v241_v24 = vmul.f32 %v239_v21, %v229_v11 }
 0x302   :  { %v290_v55 = vpop.permute.xlu1 %289 }
 0x30b   :  { %v234_v23 = vpop.permute.xlu0 %233 }
 0x30c   :  { %v236_v25 = vmul.f32 %v234_v23, %v187_v22 }
 0x30e   :  { %v242_v26 = vadd.f32 %v241_v24, %v236_v25 }
 0x310   :  { %1367 = vtanh.f32 %v242_v26  ;;  %1280 = vst.msk [vmem:[%s1941_s9 + $0x2] sm:$0x3] %vm148_vm4, %v242_v26  ;;  %1283 = vmatmul.msk.f32.vlgmr.msrb.gmra.mxu0 %vm49_vm5, %v242_v26 }
 0x311   :  { %701 = vmatpush.msrb.mxu0 %v1551_v2 }
 0x313   :  { %702 = vmatpush.msrb.mxu0 %v1556_v3 }
 0x315   :  { %703 = vmatpush.msrb.mxu0 %v1594_v7 }
 0x316   :  { %v1368_v27 = vpop.eup %1367 }
 0x317   :  { %245 = vrot.lane.b32.xlu2 %v1368_v27, %s1479_s17  ;;  %704 = vmatpush.msrb.mxu0 %v1601_v8 }
 0x371   :  { %v246_v28 = vpop.permute.xlu2 %245 }
 0x372   :  { %v248_v29 = vmul.f32 %v246_v28, %v229_v11 }
 0x374   :  { %250 = vrot.lane.b32.xlu0 %v248_v29, %s1479_s17 }
 0x38d   :  { %v282_v52 = vpop.f32.mrf.mxu0 }
 0x38e   :  { %v283_v53 = vadd.f32 %v1634_v31, %v282_v52 }
 0x3e6   :  { %v251_v30 = vpop.permute.xlu0 %250 }
 0x3e7   :  { %1279 = vst.msk [vmem:[%s1940_s8 + $0x2] sm:$0x3] %vm148_vm4, %v251_v30  ;;  %1284 = vmatmul.msk.f32.vlgmr.msrb.gmra.mxu1 %vm49_vm5, %v251_v30 }
 0x3e8   :  { %732 = vmatpush.msrb.mxu1 %v1540_v0 }
 0x3ea   :  { %733 = vmatpush.msrb.mxu1 %v1545_v1 }
 0x3ec   :  { %734 = vmatpush.msrb.mxu1 %v1562_v4 }
 0x3ee   :  { %735 = vmatpush.msrb.mxu1 %v1571_v5 }
 0x464   :  { %v313_v33 = vpop.f32.mrf.mxu1 }
 0x465   :  { %v316_v34 = vadd.f32 %v1281_v32, %v313_v33 }
 0x467   :  { %v317_v35 = vadd.f32 %v1626_v13, %v316_v34 }
 0x469   :  { %v1285_v36 = vmul.f32 -1.442695, %v317_v35  ;;  %1369 = vtanh.f32 %v317_v35 }
 0x46b   :  { %1371 = vpow2.f32 %v1285_v36 }
 0x46c   :  { %1373 = vrcp.f32 %v1289_v37 }
 0x46f   :  { %v1370_v38 = vpop.eup %1369 }
 0x470   :  { %344 = vrot.lane.b32.xlu0 %v1370_v38, %s1477_s13 }
 0x471   :  { %v1372_v39 = vpop.eup %1371 }
 0x472   :  { %v321_v40 = vadd.f32 1.0, %v1372_v39  ;;  %v1374_v41 = vpop.eup %1373 }
 0x474   :  { %1375 = vrcp.f32 %v321_v40  ;;  %v333_v45 = vand.u32 2147483648, %v321_v40  ;;  %v331_v47 = vand.u32 2147483647, %v321_v40  ;;  %vm327_vm11 = vweird.f32 %v321_v40 }
 0x475   :  { %1377 = vtanh.f32 %v283_v53 }
 0x476   :  { %v334_v49 = vor.u32 1.1754944e-38, %v333_v45  ;;  %vm332_vm13 = vcmp.eq.f32.partialorder %v331_v47, 8.507059e+37  ;;  %v1303_v47 = vld [vmem:[%s1933_s1 + $0xa] sm:$0x3] }
 0x478   :  { %395 = vperm.xlu0 %1338, %v1374_v41  }
 0x47a   :  { %v1376_v42 = vpop.eup %1375 }
 0x47b   :  { %v323_v43 = vmul.f32 %v1376_v42, %v321_v40  ;;  %vm328_vm10 = vweird.f32 %v1376_v42  ;;  %v1378_v54 = vpop.eup %1377 }
 0x47c   :  { %vm329_vm12 = vmor %vm327_vm11, %vm328_vm10  ;;  %v292_v56 = vmul.f32 %v1378_v54, %v290_v55  ;;  %v286_v57 = vsub.f32 %v242_v26, %v1378_v54 }
 0x47d   :  { %v324_v44 = vsub.f32 1.0, %v323_v43 }
 0x47e   :  { %v293_v59 = vadd.f32 %v292_v56, %v286_v57 }
 0x47f   :  { %v325_v46 = vmul.f32 %v1376_v42, %v324_v44 }
 0x481   :  { %v326_v48 = vadd.f32 %v1376_v42, %v325_v46 }
 0x483   :  { %v330_v50 = vsel %vm329_vm12, %v1376_v42, %v326_v48  ;;  %v1295_v42 = vld [vmem:[%s1932_s0 + $0x8] sm:$0x3] }
 0x484   :  { %v335_v51 = vsel %vm332_vm13, %v334_v49, %v330_v50 }
 0x485   :  { %339 = vrot.lane.b32.xlu2 %v335_v51, %s1478_s4 }
 0x4df   :  { %v340_v58 = vpop.permute.xlu2 %339 }
 0x4e0   :  { %v342_v61 = vmul.f32 %v340_v58, %v293_v59 }
 0x4e2   :  { %v345_v60 = vpop.permute.xlu0 %344 }
 0x4e3   :  { %v347_v62 = vmul.f32 %v345_v60, %v335_v51 }
 0x4e5   :  { %v348_v63 = vadd.f32 %v347_v62, %v342_v61 }
 0x4e7   :  { %1379 = vtanh.f32 %v348_v63  ;;  %1287 = vst.msk [vmem:[%s1941_s9 + $0x4] sm:$0x3] %vm148_vm4, %v348_v63  ;;  %1290 = vmatmul.msk.f32.vlgmr.msrb.gmra.mxu2 %vm49_vm5, %v348_v63 }
 0x4e8   :  { %807 = vmatpush.msrb.mxu2 %v1551_v2  ;;  %v1288_v2 = vld [vmem:[%s1932_s0 + $0x6] sm:$0x3] }
 0x4ea   :  { %808 = vmatpush.msrb.mxu2 %v1556_v3  ;;  %v396_v28 = vpop.permute.xlu0 %395 }
 0x4ec   :  { %809 = vmatpush.msrb.mxu2 %v1594_v7 }
 0x4ed   :  { %v1380_v6 = vpop.eup %1379 }
 0x4ee   :  { %351 = vrot.lane.b32.xlu1 %v1380_v6, %s1479_s17  ;;  %810 = vmatpush.msrb.mxu2 %v1601_v8 }
 0x560   :  { %v352_v9 = vpop.permute.xlu1 %351 }
 0x561   :  { %v354_v10 = vmul.f32 %v352_v9, %v335_v51 }
 0x563   :  { %356 = vrot.lane.b32.xlu2 %v354_v10, %s1479_s17 }
 0x56a   :  { %v388_v25 = vpop.f32.mrf.mxu2 }
 0x56b   :  { %v389_v26 = vadd.f32 %v1634_v31, %v388_v25 }
 0x5bd   :  { %v357_v11 = vpop.permute.xlu2 %356 }
 0x5be   :  { %1286 = vst.msk [vmem:[%s1940_s8 + $0x4] sm:$0x3] %vm148_vm4, %v357_v11  ;;  %1291 = vmatmul.msk.f32.vlgmr.msrb.gmra.mxu3 %vm49_vm5, %v357_v11 }
 0x5bf   :  { %838 = vmatpush.msrb.mxu3 %v1540_v0  ;;  %v1296_v0 = vld [vmem:[%s1933_s1 + $0x8] sm:$0x3] }
 0x5c1   :  { %839 = vmatpush.msrb.mxu3 %v1545_v1 }
 0x5c3   :  { %840 = vmatpush.msrb.mxu3 %v1562_v4 }
 0x5c5   :  { %841 = vmatpush.msrb.mxu3 %v1571_v5 }
 0x641   :  { %v419_v3 = vpop.f32.mrf.mxu3 }
 0x642   :  { %v422_v7 = vadd.f32 %v1288_v2, %v419_v3 }
 0x644   :  { %v423_v8 = vadd.f32 %v1626_v13, %v422_v7 }
 0x646   :  { %v1292_v12 = vmul.f32 -1.442695, %v423_v8  ;;  %1381 = vtanh.f32 %v423_v8 }
 0x648   :  { %1383 = vpow2.f32 %v1292_v12 }
 0x649   :  { %1385 = vrcp.f32 %v1296_v0 }
 0x64c   :  { %v1382_v1 = vpop.eup %1381 }
 0x64d   :  { %450 = vrot.lane.b32.xlu2 %v1382_v1, %s1477_s13 }
 0x64e   :  { %v1384_v4 = vpop.eup %1383 }
 0x64f   :  { %v427_v5 = vadd.f32 1.0, %v1384_v4  ;;  %v1386_v14 = vpop.eup %1385 }
 0x651   :  { %1387 = vrcp.f32 %v427_v5  ;;  %v439_v18 = vand.u32 2147483648, %v427_v5  ;;  %v437_v20 = vand.u32 2147483647, %v427_v5  ;;  %vm433_vm15 = vweird.f32 %v427_v5 }
 0x652   :  { %1389 = vtanh.f32 %v389_v26 }
 0x653   :  { %v440_v22 = vor.u32 1.1754944e-38, %v439_v18  ;;  %vm438_vm1 = vcmp.eq.f32.partialorder %v437_v20, 8.507059e+37  ;;  %v1310_v20 = vld [vmem:[%s1933_s1 + $0xc] sm:$0x3] }
 0x655   :  { %501 = vperm.xlu2 %1339, %v1386_v14  }
 0x657   :  { %v1388_v15 = vpop.eup %1387 }
 0x658   :  { %v429_v16 = vmul.f32 %v1388_v15, %v427_v5  ;;  %vm434_vm14 = vweird.f32 %v1388_v15  ;;  %v1390_v27 = vpop.eup %1389 }
 0x659   :  { %vm435_vm0 = vmor %vm433_vm15, %vm434_vm14  ;;  %v392_v29 = vsub.f32 %v348_v63, %v1390_v27  ;;  %v398_v30 = vmul.f32 %v1390_v27, %v396_v28 }
 0x65a   :  { %v430_v17 = vsub.f32 1.0, %v429_v16 }
 0x65b   :  { %v399_v33 = vadd.f32 %v398_v30, %v392_v29 }
 0x65c   :  { %v431_v19 = vmul.f32 %v1388_v15, %v430_v17 }
 0x65e   :  { %v432_v21 = vadd.f32 %v1388_v15, %v431_v19 }
 0x660   :  { %v436_v23 = vsel %vm435_vm0, %v1388_v15, %v432_v21  ;;  %v1302_v15 = vld [vmem:[%s1932_s0 + $0xa] sm:$0x3] }
 0x661   :  { %v441_v24 = vsel %vm438_vm1, %v440_v22, %v436_v23 }
 0x662   :  { %445 = vrot.lane.b32.xlu1 %v441_v24, %s1478_s4 }
 0x6a7   :  { %v451_v32 = vpop.permute.xlu2 %450 }
 0x6a8   :  { %v453_v35 = vmul.f32 %v451_v32, %v441_v24 }
 0x6af   :  { %v502_v9 = vpop.permute.xlu2 %501 }
 0x6d4   :  { %v446_v34 = vpop.permute.xlu1 %445 }
 0x6d5   :  { %v448_v36 = vmul.f32 %v446_v34, %v399_v33 }
 0x6d7   :  { %v454_v37 = vadd.f32 %v453_v35, %v448_v36 }
 0x6d9   :  { %1391 = vtanh.f32 %v454_v37  ;;  %1294 = vst.msk [vmem:[%s1941_s9 + $0x6] sm:$0x3] %vm148_vm4, %v454_v37  ;;  %1297 = vmatmul.msk.f32.vlgmr.msra.gmra.mxu0 %vm49_vm5, %v454_v37 }
 0x6df   :  { %v1392_v38 = vpop.eup %1391 }
 0x6e0   :  { %457 = vrot.lane.b32.xlu0 %v1392_v38, %s1479_s17 }
 0x752   :  { %v458_v39 = vpop.permute.xlu0 %457 }
 0x753   :  { %v460_v40 = vmul.f32 %v458_v39, %v441_v24 }
 0x755   :  { %462 = vrot.lane.b32.xlu1 %v460_v40, %s1479_s17 }
 0x756   :  { %v494_v62 = vpop.f32.mrf.mxu0 }
 0x757   :  { %v495_v63 = vadd.f32 %v1634_v31, %v494_v62 }
 0x7c7   :  { %v463_v41 = vpop.permute.xlu1 %462 }
 0x7c8   :  { %1293 = vst.msk [vmem:[%s1940_s8 + $0x6] sm:$0x3] %vm148_vm4, %v463_v41  ;;  %1298 = vmatmul.msk.f32.vlgmr.msra.gmra.mxu1 %vm49_vm5, %v463_v41 }
 0x845   :  { %v525_v43 = vpop.f32.mrf.mxu1 }
 0x846   :  { %v528_v44 = vadd.f32 %v1295_v42, %v525_v43 }
 0x848   :  { %v529_v45 = vadd.f32 %v1626_v13, %v528_v44 }
 0x84a   :  { %v1299_v46 = vmul.f32 -1.442695, %v529_v45  ;;  %1393 = vtanh.f32 %v529_v45 }
 0x84c   :  { %1395 = vpow2.f32 %v1299_v46 }
 0x84d   :  { %1397 = vrcp.f32 %v1303_v47 }
 0x850   :  { %v1394_v48 = vpop.eup %1393 }
 0x851   :  { %556 = vrot.lane.b32.xlu1 %v1394_v48, %s1477_s13 }
 0x852   :  { %v1396_v49 = vpop.eup %1395 }
 0x853   :  { %v533_v50 = vadd.f32 1.0, %v1396_v49  ;;  %v1398_v51 = vpop.eup %1397 }
 0x855   :  { %1399 = vrcp.f32 %v533_v50  ;;  %v545_v55 = vand.u32 2147483648, %v533_v50  ;;  %v543_v57 = vand.u32 2147483647, %v533_v50  ;;  %vm539_vm3 = vweird.f32 %v533_v50 }
 0x856   :  { %1401 = vtanh.f32 %v495_v63 }
 0x857   :  { %v546_v59 = vor.u32 1.1754944e-38, %v545_v55  ;;  %vm544_vm7 = vcmp.eq.f32.partialorder %v543_v57, 8.507059e+37  ;;  %v1317_v57 = vld [vmem:[%s1933_s1 + $0xe] sm:$0x3] }
 0x859   :  { %607 = vperm.xlu1 %1340, %v1398_v51  }
 0x85b   :  { %v1400_v52 = vpop.eup %1399 }
 0x85c   :  { %v535_v53 = vmul.f32 %v1400_v52, %v533_v50  ;;  %vm540_vm2 = vweird.f32 %v1400_v52  ;;  %v1402_v6 = vpop.eup %1401 }
 0x85d   :  { %vm541_vm6 = vmor %vm539_vm3, %vm540_vm2  ;;  %v498_v10 = vsub.f32 %v454_v37, %v1402_v6  ;;  %v504_v11 = vmul.f32 %v1402_v6, %v502_v9 }
 0x85e   :  { %v536_v54 = vsub.f32 1.0, %v535_v53 }
 0x85f   :  { %v505_v3 = vadd.f32 %v504_v11, %v498_v10 }
 0x860   :  { %v537_v56 = vmul.f32 %v1400_v52, %v536_v54 }
 0x862   :  { %v538_v58 = vadd.f32 %v1400_v52, %v537_v56 }
 0x864   :  { %v542_v60 = vsel %vm541_vm6, %v1400_v52, %v538_v58  ;;  %v1309_v52 = vld [vmem:[%s1932_s0 + $0xc] sm:$0x3]  ;;  %vm922_vm6 = vcmask 1041409  }
 0x865   :  { %v547_v61 = vsel %vm544_vm7, %v546_v59, %v542_v60  ;;  %vm925_vm7 = vcmask 1042434  }
 0x866   :  { %551 = vrot.lane.b32.xlu0 %v547_v61, %s1478_s4 }
 0x8c3   :  { %v557_v2 = vpop.permute.xlu1 %556 }
 0x8c4   :  { %v559_v8 = vmul.f32 %v557_v2, %v547_v61 }
 0x8cb   :  { %v608_v39 = vpop.permute.xlu1 %607 }
 0x8d8   :  { %v552_v7 = vpop.permute.xlu0 %551 }
 0x8d9   :  { %v554_v12 = vmul.f32 %v552_v7, %v505_v3 }
 0x8db   :  { %v560_v0 = vadd.f32 %v559_v8, %v554_v12 }
 0x8dd   :  { %1403 = vtanh.f32 %v560_v0  ;;  %1301 = vst.msk [vmem:[%s1941_s9 + $0x8] sm:$0x3] %vm148_vm4, %v560_v0  ;;  %1304 = vmatmul.msk.f32.vlgmr.msra.gmra.mxu2 %vm49_vm5, %v560_v0 }
 0x8e3   :  { %v1404_v1 = vpop.eup %1403 }
 0x8e4   :  { %563 = vrot.lane.b32.xlu2 %v1404_v1, %s1479_s17 }
 0x93e   :  { %v564_v4 = vpop.permute.xlu2 %563 }
 0x93f   :  { %v566_v5 = vmul.f32 %v564_v4, %v547_v61 }
 0x941   :  { %568 = vrot.lane.b32.xlu0 %v566_v5, %s1479_s17 }
 0x960   :  { %v600_v36 = vpop.f32.mrf.mxu2 }
 0x961   :  { %v601_v37 = vadd.f32 %v1634_v31, %v600_v36 }
 0x9b3   :  { %v569_v14 = vpop.permute.xlu0 %568 }
 0x9b4   :  { %1300 = vst.msk [vmem:[%s1940_s8 + $0x8] sm:$0x3] %vm148_vm4, %v569_v14  ;;  %1305 = vmatmul.msk.f32.vlgmr.msra.gmra.mxu3 %vm49_vm5, %v569_v14 }
 0xa37   :  { %v631_v16 = vpop.f32.mrf.mxu3 }
 0xa38   :  { %v634_v17 = vadd.f32 %v1302_v15, %v631_v16 }
 0xa3a   :  { %v635_v18 = vadd.f32 %v1626_v13, %v634_v17 }
 0xa3c   :  { %v1306_v19 = vmul.f32 -1.442695, %v635_v18  ;;  %1405 = vtanh.f32 %v635_v18 }
 0xa3e   :  { %1407 = vpow2.f32 %v1306_v19 }
 0xa3f   :  { %1409 = vrcp.f32 %v1310_v20 }
 0xa42   :  { %v1406_v21 = vpop.eup %1405 }
 0xa43   :  { %662 = vrot.lane.b32.xlu0 %v1406_v21, %s1477_s13 }
 0xa44   :  { %v1408_v22 = vpop.eup %1407 }
 0xa45   :  { %v639_v23 = vadd.f32 1.0, %v1408_v22  ;;  %v1410_v24 = vpop.eup %1409 }
 0xa47   :  { %1411 = vrcp.f32 %v639_v23  ;;  %v651_v28 = vand.u32 2147483648, %v639_v23  ;;  %v649_v30 = vand.u32 2147483647, %v639_v23  ;;  %vm645_vm9 = vweird.f32 %v639_v23 }
 0xa48   :  { %1413 = vtanh.f32 %v601_v37 }
 0xa49   :  { %v652_v33 = vor.u32 1.1754944e-38, %v651_v28  ;;  %vm650_vm11 = vcmp.eq.f32.partialorder %v649_v30, 8.507059e+37 }
 0xa4b   :  { %713 = vperm.xlu0 %1338, %v1410_v24  }
 0xa4d   :  { %v1412_v25 = vpop.eup %1411 }
 0xa4e   :  { %v641_v26 = vmul.f32 %v1412_v25, %v639_v23  ;;  %vm646_vm8 = vweird.f32 %v1412_v25  ;;  %v1414_v38 = vpop.eup %1413 }
 0xa4f   :  { %vm647_vm10 = vmor %vm645_vm9, %vm646_vm8  ;;  %v604_v40 = vsub.f32 %v560_v0, %v1414_v38  ;;  %v610_v41 = vmul.f32 %v1414_v38, %v608_v39  ;;  %vm931_vm8 = vcmask 1044484   ;;  %vm934_vm9 = vcmask 1045509  }
 0xa50   :  { %v642_v27 = vsub.f32 1.0, %v641_v26 }
 0xa51   :  { %v611_v43 = vadd.f32 %v610_v41, %v604_v40 }
 0xa52   :  { %v643_v29 = vmul.f32 %v1412_v25, %v642_v27 }
 0xa54   :  { %v644_v32 = vadd.f32 %v1412_v25, %v643_v29 }
 0xa56   :  { %v648_v34 = vsel %vm647_vm10, %v1412_v25, %v644_v32  ;;  %v1316_v25 = vld [vmem:[%s1932_s0 + $0xe] sm:$0x3]  ;;  %vm937_vm10 = vcmask 1046534  }
 0xa57   :  { %v653_v35 = vsel %vm650_vm11, %v652_v33, %v648_v34  ;;  %v901_v34 = vld [vmem:[%s1934_s2] sm:$0x3]  ;;  %vm940_vm11 = vcmask 1047559  }
 0xa58   :  { %657 = vrot.lane.b32.xlu2 %v653_v35, %s1478_s4 }
 0xab2   :  { %v658_v42 = vpop.permute.xlu2 %657 }
 0xab3   :  { %v660_v45 = vmul.f32 %v658_v42, %v611_v43 }
 0xab5   :  { %v663_v44 = vpop.permute.xlu0 %662 }
 0xab6   :  { %v665_v46 = vmul.f32 %v663_v44, %v653_v35 }
 0xab8   :  { %v666_v47 = vadd.f32 %v665_v46, %v660_v45  ;;  %v907_v45 = vld [vmem:[%s1934_s2 + $0xc] sm:$0x3] }
 0xaba   :  { %1415 = vtanh.f32 %v666_v47  ;;  %1308 = vst.msk [vmem:[%s1941_s9 + $0xa] sm:$0x3] %vm148_vm4, %v666_v47  ;;  %1311 = vmatmul.msk.f32.vlgmr.msrb.gmra.mxu0 %vm49_vm5, %v666_v47 }
 0xabd   :  { %v714_v4 = vpop.permute.xlu0 %713 }
 0xac0   :  { %v1416_v48 = vpop.eup %1415 }
 0xac1   :  { %669 = vrot.lane.b32.xlu1 %v1416_v48, %s1479_s17 }
 0xb33   :  { %v670_v49 = vpop.permute.xlu1 %669 }
 0xb34   :  { %v672_v50 = vmul.f32 %v670_v49, %v653_v35 }
 0xb36   :  { %674 = vrot.lane.b32.xlu2 %v672_v50, %s1479_s17 }
 0xb37   :  { %v706_v12 = vpop.f32.mrf.mxu0 }
 0xb38   :  { %v707_v0 = vadd.f32 %v1634_v31, %v706_v12 }
 0xb90   :  { %v675_v51 = vpop.permute.xlu2 %674 }
 0xb91   :  { %1307 = vst.msk [vmem:[%s1940_s8 + $0xa] sm:$0x3] %vm148_vm4, %v675_v51  ;;  %1312 = vmatmul.msk.f32.vlgmr.msrb.gmra.mxu1 %vm49_vm5, %v675_v51 }
 0xc0e   :  { %v737_v53 = vpop.f32.mrf.mxu1 }
 0xc0f   :  { %v740_v54 = vadd.f32 %v1309_v52, %v737_v53 }
 0xc11   :  { %v741_v55 = vadd.f32 %v1626_v13, %v740_v54 }
 0xc13   :  { %v1313_v56 = vmul.f32 -1.442695, %v741_v55  ;;  %1417 = vtanh.f32 %v741_v55 }
 0xc15   :  { %1419 = vpow2.f32 %v1313_v56 }
 0xc16   :  { %1421 = vrcp.f32 %v1317_v57 }
 0xc19   :  { %v1418_v58 = vpop.eup %1417 }
 0xc1a   :  { %768 = vrot.lane.b32.xlu2 %v1418_v58, %s1477_s13 }
 0xc1b   :  { %v1420_v59 = vpop.eup %1419 }
 0xc1c   :  { %v745_v60 = vadd.f32 1.0, %v1420_v59  ;;  %v1422_v61 = vpop.eup %1421  ;;  %v905_v59 = vld [vmem:[%s1934_s2 + $0x8] sm:$0x3] }
 0xc1e   :  { %1423 = vrcp.f32 %v745_v60  ;;  %v757_v9 = vand.u32 2147483648, %v745_v60  ;;  %v755_v11 = vand.u32 2147483647, %v745_v60  ;;  %vm751_vm13 = vweird.f32 %v745_v60 }
 0xc1f   :  { %1425 = vtanh.f32 %v707_v0 }
 0xc20   :  { %v758_v3 = vor.u32 1.1754944e-38, %v757_v9  ;;  %vm756_vm15 = vcmp.eq.f32.partialorder %v755_v11, 8.507059e+37  ;;  %v912_v9 = vld [vmem:[%s1939_s7 + $0x18] sm:$0xff]  ;;  %v910_v11 = vld [vmem:[%s1939_s7 + $0x8] sm:$0xff] }
 0xc21   :  { %956 = vmatpush.msra.mxu0 %v912_v9  ;;  %1072 = vmatpush.msra.mxu1 %v912_v9 }
 0xc22   :  { %819 = vperm.xlu2 %1339, %v1422_v61  }
 0xc24   :  { %v1424_v62 = vpop.eup %1423 }
 0xc25   :  { %v747_v63 = vmul.f32 %v1424_v62, %v745_v60  ;;  %vm752_vm12 = vweird.f32 %v1424_v62  ;;  %v1426_v1 = vpop.eup %1425  ;;  %v908_v60 = vld [vmem:[%s1934_s2 + $0xe] sm:$0x3] }
 0xc26   :  { %vm753_vm14 = vmor %vm751_vm13, %vm752_vm12  ;;  %v710_v5 = vsub.f32 %v666_v47, %v1426_v1  ;;  %v716_v14 = vmul.f32 %v1426_v1, %v714_v4  ;;  %v896_v1 = vld [vmem:[%s1940_s8 + $0x6] sm:$0x3]  ;;  %vm964_vm12 = vcmask 31744   ;;  %vm1186_vm13 = vcmask 257024  }
 0xc27   :  { %v748_v6 = vsub.f32 1.0, %v747_v63  ;;  %v903_v63 = vld [vmem:[%s1934_s2 + $0x4] sm:$0x3] }
 0xc28   :  { %v717_v16 = vadd.f32 %v716_v14, %v710_v5  ;;  %v897_v14 = vld [vmem:[%s1940_s8 + $0x8] sm:$0x3] }
 0xc29   :  { %v749_v10 = vmul.f32 %v1424_v62, %v748_v6  ;;  %v906_v6 = vld [vmem:[%s1934_s2 + $0xa] sm:$0x3] }
 0xc2b   :  { %v750_v2 = vadd.f32 %v1424_v62, %v749_v10  ;;  %v911_v10 = vld [vmem:[%s1939_s7 + $0x10] sm:$0xff] }
 0xc2c   :  { %957 = vmatpush.msra.mxu0 %v911_v10  ;;  %1073 = vmatpush.msra.mxu1 %v911_v10 }
 0xc2d   :  { %v754_v7 = vsel %vm753_vm14, %v1424_v62, %v750_v2  ;;  %v909_v2 = vld [vmem:[%s1939_s7] sm:$0xff] }
 0xc2e   :  { %v759_v8 = vsel %vm756_vm15, %v758_v3, %v754_v7  ;;  %958 = vmatpush.msra.mxu0 %v910_v11  ;;  %1074 = vmatpush.msra.mxu1 %v910_v11  ;;  %v894_v3 = vld [vmem:[%s1940_s8 + $0x2] sm:$0x3]  ;;  %v893_v7 = vld [vmem:[%s1940_s8] sm:$0x3] }
 0xc2f   :  { %763 = vrot.lane.b32.xlu1 %v759_v8, %s1478_s4  ;;  %v921_v12 = vrot.slane %v894_v3, 7  ;;  %v1044_v4 = vrot.slane %v893_v7, 1 }
 0xc30   :  { %959 = vmatpush.msra.mxu0 %v909_v2  ;;  %1075 = vmatpush.msra.mxu1 %v909_v2 }
 0xc74   :  { %v769_v15 = vpop.permute.xlu2 %768 }
 0xc75   :  { %v771_v18 = vmul.f32 %v769_v15, %v759_v8 }
 0xc7c   :  { %v820_v49 = vpop.permute.xlu2 %819 }
 0xca1   :  { %v764_v17 = vpop.permute.xlu1 %763 }
 0xca2   :  { %v766_v19 = vmul.f32 %v764_v17, %v717_v16  ;;  %v898_v16 = vld [vmem:[%s1940_s8 + $0xa] sm:$0x3]  ;;  %v1045_v17 = vsel %vm922_vm6, %v894_v3, %v1044_v4 }
 0xca4   :  { %v772_v20 = vadd.f32 %v771_v18, %v766_v19  ;;  %v927_v19 = vrot.slane %v896_v1, 5 }
 0xca6   :  { %1427 = vtanh.f32 %v772_v20  ;;  %1315 = vst.msk [vmem:[%s1941_s9 + $0xc] sm:$0x3] %vm148_vm4, %v772_v20  ;;  %1318 = vmatmul.msk.f32.vlgmr.msrb.gmra.mxu2 %vm49_vm5, %v772_v20 }
 0xcac   :  { %v1428_v21 = vpop.eup %1427 }
 0xcad   :  { %775 = vrot.lane.b32.xlu0 %v1428_v21, %s1479_s17  ;;  %v923_v21 = vsel %vm922_vm6, %v921_v12, %v893_v7 }
 0xd1f   :  { %v776_v22 = vpop.permute.xlu0 %775 }
 0xd20   :  { %v778_v23 = vmul.f32 %v776_v22, %v759_v8  ;;  %v895_v8 = vld [vmem:[%s1940_s8 + $0x4] sm:$0x3]  ;;  %v930_v22 = vrot.slane %v897_v14, 4 }
 0xd21   :  { %v924_v5 = vrot.slane %v895_v8, 6  ;;  %v1046_v15 = vrot.slane %v895_v8, 7 }
 0xd22   :  { %780 = vrot.lane.b32.xlu1 %v778_v23, %s1479_s17  ;;  %v1050_v23 = vrot.slane %v897_v14, 5 }
 0xd29   :  { %v812_v46 = vpop.f32.mrf.mxu2 }
 0xd2a   :  { %v813_v47 = vadd.f32 %v1634_v31, %v812_v46  ;;  %v902_v31 = vld [vmem:[%s1934_s2 + $0x2] sm:$0x3] }
 0xd94   :  { %v781_v24 = vpop.permute.xlu1 %780 }
 0xd95   :  { %1314 = vst.msk [vmem:[%s1940_s8 + $0xc] sm:$0x3] %vm148_vm4, %v781_v24  ;;  %1319 = vmatmul.msk.f32.vlgmr.msrb.gmra.mxu3 %vm49_vm5, %v781_v24  ;;  %v926_v24 = vsel %vm925_vm7, %v924_v5, %v923_v21 }
 0xd9c   :  { %v899_v18 = vld [vmem:[%s1940_s8 + $0xc] sm:$0x3] }
 0xe18   :  { %v843_v26 = vpop.f32.mrf.mxu3 }
 0xe19   :  { %v846_v27 = vadd.f32 %v1316_v25, %v843_v26  ;;  %v933_v25 = vrot.slane %v898_v16, 3  ;;  %v1052_v26 = vrot.slane %v898_v16, 4 }
 0xe1b   :  { %v847_v28 = vadd.f32 %v1626_v13, %v846_v27  ;;  %v904_v13 = vld [vmem:[%s1934_s2 + $0x6] sm:$0x3]  ;;  %v1047_v27 = vsel %vm925_vm7, %v1046_v15, %v1045_v17 }
 0xe1d   :  { %v1320_v29 = vmul.f32 -1.442695, %v847_v28  ;;  %1429 = vtanh.f32 %v847_v28  ;;  %v936_v28 = vrot.slane %v899_v18, 2 }
 0xe1f   :  { %1431 = vpow2.f32 %v1320_v29  ;;  %v1054_v29 = vrot.slane %v899_v18, 3 }
 0xe23   :  { %v1430_v30 = vpop.eup %1429 }
 0xe24   :  { %874 = vrot.lane.b32.xlu1 %v1430_v30, %s1477_s13 }
 0xe25   :  { %v1432_v32 = vpop.eup %1431 }
 0xe26   :  { %v851_v33 = vadd.f32 1.0, %v1432_v32 }
 0xe28   :  { %1433 = vrcp.f32 %v851_v33  ;;  %v863_v38 = vand.u32 2147483648, %v851_v33  ;;  %v861_v40 = vand.u32 2147483647, %v851_v33  ;;  %vm857_vm1 = vweird.f32 %v851_v33 }
 0xe29   :  { %1435 = vtanh.f32 %v813_v47 }
 0xe2a   :  { %v864_v42 = vor.u32 1.1754944e-38, %v863_v38  ;;  %vm862_vm3 = vcmp.eq.f32.partialorder %v861_v40, 8.507059e+37 }
 0xe2c   :  { %986 = vperm.xlu1 %1340, %v901_v34  }
 0xe2e   :  { %v1434_v35 = vpop.eup %1433 }
 0xe2f   :  { %v853_v36 = vmul.f32 %v1434_v35, %v851_v33  ;;  %vm858_vm0 = vweird.f32 %v1434_v35  ;;  %v1436_v48 = vpop.eup %1435 }
 0xe30   :  { %vm859_vm2 = vmor %vm857_vm1, %vm858_vm0  ;;  %v816_v50 = vsub.f32 %v772_v20, %v1436_v48  ;;  %v822_v51 = vmul.f32 %v1436_v48, %v820_v49  ;;  %v1048_v20 = vrot.slane %v896_v1, 6 }
 0xe31   :  { %v854_v37 = vsub.f32 1.0, %v853_v36 }
 0xe32   :  { %v823_v53 = vadd.f32 %v822_v51, %v816_v50 }
 0xe33   :  { %v855_v39 = vmul.f32 %v1434_v35, %v854_v37 }
 0xe34   :  { %998 = vperm.xlu1 %1340, %v904_v13  }
 0xe35   :  { %v856_v41 = vadd.f32 %v1434_v35, %v855_v39 }
 0xe37   :  { %v860_v43 = vsel %vm859_vm2, %v1434_v35, %v856_v41 }
 0xe38   :  { %v865_v44 = vsel %vm862_vm3, %v864_v42, %v860_v43 }
 0xe39   :  { %869 = vrot.lane.b32.xlu0 %v865_v44, %s1478_s4 }
 0xe3c   :  { %1010 = vperm.xlu1 %1340, %v907_v45  }
 0xe96   :  { %v875_v52 = vpop.permute.xlu1 %874 }
 0xe97   :  { %v877_v55 = vmul.f32 %v875_v52, %v865_v44 }
 0xeab   :  { %v870_v54 = vpop.permute.xlu0 %869 }
 0xeac   :  { %v872_v56 = vmul.f32 %v870_v54, %v823_v53 }
 0xeae   :  { %v878_v57 = vadd.f32 %v877_v55, %v872_v56 }
 0xeb0   :  { %1437 = vtanh.f32 %v878_v57  ;;  %1322 = vst.msk [vmem:[%s1941_s9 + $0xe] sm:$0x3] %vm148_vm4, %v878_v57 }
 0xeb6   :  { %v1438_v58 = vpop.eup %1437 }
 0xeb7   :  { %881 = vrot.lane.b32.xlu2 %v1438_v58, %s1479_s17 }
 0xebf   :  { %990 = vperm.xlu2 %1339, %v902_v31  }
 0xec7   :  { %1002 = vperm.xlu2 %1339, %v905_v59  }
 0xecf   :  { %1014 = vperm.xlu2 %1339, %v908_v60  }
 0xf11   :  { %v882_v61 = vpop.permute.xlu2 %881 }
 0xf12   :  { %v884_v62 = vmul.f32 %v882_v61, %v865_v44 }
 0xf14   :  { %886 = vrot.lane.b32.xlu0 %v884_v62, %s1479_s17  ;;  %v987_v62 = vpop.permute.xlu1 %986 }
 0xf15   :  { %v1099_v15 = vrot.slane %v987_v62, 1 }
 0xf1c   :  { %994 = vperm.xlu0 %1338, %v903_v63   ;;  %v991_v63 = vpop.permute.xlu2 %990  ;;  %v999_v8 = vpop.permute.xlu1 %998 }
 0xf1d   :  { %v1016_v12 = vrot.slane %v991_v63, 7 }
 0xf1f   :  { %v1017_v18 = vsel %vm922_vm6, %v1016_v12, %v987_v62 }
 0xf24   :  { %1006 = vperm.xlu0 %1338, %v906_v6   ;;  %v1003_v16 = vpop.permute.xlu2 %1002 }
 0xf86   :  { %v887_v0 = vpop.permute.xlu0 %886 }
 0xf87   :  { %1321 = vst.msk [vmem:[%s1940_s8 + $0xe] sm:$0x3] %vm148_vm4, %v887_v0  ;;  %vm928_vm4 = vcmask 1043459  }
 0xf88   :  { %v929_v30 = vsel %vm928_vm4, %v927_v19, %v926_v24  ;;  %v1049_v32 = vsel %vm928_vm4, %v1048_v20, %v1047_v27  ;;  %v1100_v20 = vsel %vm922_vm6, %v991_v63, %v1099_v15  ;;  %v1020_v24 = vrot.slane %v999_v8, 5 }
 0xf89   :  { %v932_v34 = vsel %vm931_vm8, %v930_v22, %v929_v30  ;;  %v1051_v35 = vsel %vm931_vm8, %v1050_v23, %v1049_v32  ;;  %v1103_v27 = vrot.slane %v999_v8, 6 }
 0xf8a   :  { %v935_v36 = vsel %vm934_vm9, %v933_v25, %v932_v34  ;;  %v1053_v37 = vsel %vm934_vm9, %v1052_v26, %v1051_v35 }
 0xf8b   :  { %v938_v39 = vsel %vm937_vm10, %v936_v28, %v935_v36  ;;  %v1055_v40 = vsel %vm937_vm10, %v1054_v29, %v1053_v37  ;;  %v1105_v37 = vrot.slane %v1003_v16, 5 }
 0xf8e   :  { %v900_v33 = vld [vmem:[%s1940_s8 + $0xe] sm:$0x3]  ;;  %v995_v6 = vpop.permute.xlu0 %994 }
 0xf8f   :  { %v939_v13 = vrot.slane %v900_v33, 1  ;;  %v1056_v38 = vrot.slane %v900_v33, 2  ;;  %v1018_v1 = vrot.slane %v995_v6, 6  ;;  %v1101_v5 = vrot.slane %v995_v6, 7 }
 0xf90   :  { %v1022_v33 = vrot.slane %v1003_v16, 4 }
 0xf91   :  { %v941_v41 = vsel %vm940_vm11, %v939_v13, %v938_v39  ;;  %v1057_v42 = vsel %vm940_vm11, %v1056_v38, %v1055_v40  ;;  %v1019_v21 = vsel %vm925_vm7, %v1018_v1, %v1017_v18  ;;  %v1102_v25 = vsel %vm925_vm7, %v1101_v5, %v1100_v20  ;;  %v1011_v13 = vpop.permute.xlu1 %1010 }
 0xf92   :  { %1323 = vmatmul.msk.f32.vlgmr.msra.gmra.mxu0 %vm49_vm5, %v941_v41  ;;  %1324 = vmatmul.msk.f32.vlgmr.msra.gmra.mxu1 %vm49_vm5, %v1057_v42  ;;  %v1021_v29 = vsel %vm928_vm4, %v1020_v24, %v1019_v21  ;;  %v1104_v34 = vsel %vm928_vm4, %v1103_v27, %v1102_v25  ;;  %vm1162_vm5 = vcmask 64512  }
 0xf93   :  { %1181 = vmatpush.msra.mxu2 %v941_v41  ;;  %1240 = vmatpush.msra.mxu3 %v1057_v42  ;;  %v1023_v38 = vsel %vm931_vm8, %v1022_v33, %v1021_v29  ;;  %v1106_v40 = vsel %vm931_vm8, %v1105_v37, %v1104_v34  ;;  %v1026_v41 = vrot.slane %v1011_v13, 2  ;;  %v1015_v42 = vpop.permute.xlu2 %1014 }
 0xf96   :  { %v1007_v22 = vpop.permute.xlu0 %1006 }
 0xf97   :  { %v1024_v30 = vrot.slane %v1007_v22, 3  ;;  %v1107_v35 = vrot.slane %v1007_v22, 4 }
 0xf99   :  { %v1025_v39 = vsel %vm934_vm9, %v1024_v30, %v1023_v38 }
0x100f   :  { %v961_v43 = vpop.f32.mrf.mxu0  ;;  %v1077_v44 = vpop.f32.mrf.mxu1 }
0x1010   :  { %v965_v45 = vsel %vm964_vm12, %v961_v43, -inf  ;;  %v1080_v46 = vsel %vm964_vm12, %v1077_v44, -inf }
0x1011   :  { %v966_v47 = vrot.slane %v965_v45, 4  ;;  %v1081_v48 = vrot.slane %v1080_v46, 4 }
0x1013   :  { %v967_v49 = vmax.f32 %v965_v45, %v966_v47  ;;  %v1082_v50 = vmax.f32 %v1080_v46, %v1081_v48  ;;  %v1027_v45 = vsel %vm937_vm10, %v1026_v41, %v1025_v39  ;;  %v1028_v47 = vrot.slane %v1015_v42, 1 }
0x1015   :  { %v968_v51 = vrot.slane %v967_v49, 2  ;;  %v1083_v52 = vrot.slane %v1082_v50, 2 }
0x1017   :  { %v969_v53 = vmax.f32 %v967_v49, %v968_v51  ;;  %v1084_v54 = vmax.f32 %v1082_v50, %v1083_v52  ;;  %v1111_v50 = vrot.slane %v1015_v42, 2 }
0x1019   :  { %v970_v55 = vrot.slane %v969_v53, 1  ;;  %v1085_v56 = vrot.slane %v1084_v54, 1 }
0x101b   :  { %v971_v57 = vmax.f32 %v969_v53, %v970_v55  ;;  %v1086_v58 = vmax.f32 %v1084_v54, %v1085_v56  ;;  %v1029_v53 = vsel %vm940_vm11, %v1028_v47, %v1027_v45 }
0x101d   :  { %v972_v31 = vsub.f32 %v961_v43, %v971_v57  ;;  %v1087_v59 = vsub.f32 %v1077_v44, %v1086_v58  ;;  %v1108_v43 = vsel %vm934_vm9, %v1107_v35, %v1106_v40  ;;  %v1109_v44 = vrot.slane %v1011_v13, 3 }
0x101f   :  { %v973_v60 = vmul.f32 1.442695, %v972_v31  ;;  %v1088_v61 = vmul.f32 1.442695, %v1087_v59  ;;  %v1110_v48 = vsel %vm937_vm10, %v1109_v44, %v1108_v43 }
0x1020   :  { %v1112_v54 = vsel %vm940_vm11, %v1111_v50, %v1110_v48 }
0x1021   :  { %1439 = vpow2.f32 %v973_v60 }
0x1022   :  { %1441 = vpow2.f32 %v1088_v61 }
0x1027   :  { %v1440_v9 = vpop.eup %1439 }
0x1028   :  { %v1442_v10 = vpop.eup %1441  ;;  %v975_v11 = vsel %vm964_vm12, %v1440_v9, 0.0 }
0x1029   :  { %v976_v2 = vrot.slane %v975_v11, 4  ;;  %v1090_v3 = vsel %vm964_vm12, %v1442_v10, 0.0 }
0x102a   :  { %v1091_v7 = vrot.slane %v1090_v3, 4 }
0x102b   :  { %v977_v0 = vadd.f32 %v976_v2, %v975_v11 }
0x102c   :  { %v1092_v4 = vadd.f32 %v1091_v7, %v1090_v3 }
0x102d   :  { %v978_v14 = vrot.slane %v977_v0, 2 }
0x102e   :  { %v1093_v17 = vrot.slane %v1092_v4, 2 }
0x102f   :  { %v979_v19 = vadd.f32 %v978_v14, %v977_v0 }
0x1030   :  { %v1094_v23 = vadd.f32 %v1093_v17, %v1092_v4 }
0x1031   :  { %v980_v26 = vrot.slane %v979_v19, 1 }
0x1032   :  { %v1095_v28 = vrot.slane %v1094_v23, 1 }
0x1033   :  { %v981_v32 = vadd.f32 %v980_v26, %v979_v19 }
0x1034   :  { %v1096_v36 = vadd.f32 %v1095_v28, %v1094_v23 }
0x1035   :  { %1443 = vrcp.f32 %v981_v32 }
0x1036   :  { %1445 = vrcp.f32 %v1096_v36 }
0x103b   :  { %v1444_v46 = vpop.eup %1443 }
0x103c   :  { %v1446_v49 = vpop.eup %1445  ;;  %v983_v51 = vmul.f32 %v1444_v46, %v1440_v9 }
0x103d   :  { %v1098_v52 = vmul.f32 %v1446_v49, %v1442_v10 }
0x103e   :  { %v1031_v55 = vmul.f32 %v1029_v53, %v983_v51 }
0x103f   :  { %v1114_v56 = vmul.f32 %v1112_v54, %v1098_v52 }
0x1040   :  { %v1032_v57 = vsel %vm964_vm12, %v1031_v55, 0.0 }
0x1041   :  { %v1115_v58 = vsel %vm964_vm12, %v1114_v56, 0.0  ;;  %1033 = vadd.xlane.f32.xlu0 %v1032_v57 }
0x1042   :  { %1116 = vadd.xlane.f32.xlu1 %v1115_v58 }
0x10b4   :  { %v1034_v31 = vpop.xlane.xlu0 %1033 }
0x10b5   :  { %v1117_v59 = vpop.xlane.xlu1 %1116  ;;  %v1035_v60 = vrot.slane %v1034_v31, 4 }
0x10b6   :  { %v1118_v61 = vrot.slane %v1117_v59, 4 }
0x10b7   :  { %v1036_v62 = vadd.f32 %v1035_v60, %v1034_v31 }
0x10b8   :  { %v1119_v63 = vadd.f32 %v1118_v61, %v1117_v59 }
0x10b9   :  { %v1037_v6 = vrot.slane %v1036_v62, 2 }
0x10ba   :  { %v1120_v9 = vrot.slane %v1119_v63, 2 }
0x10bb   :  { %v1038_v10 = vadd.f32 %v1037_v6, %v1036_v62 }
0x10bc   :  { %v1121_v11 = vadd.f32 %v1120_v9, %v1119_v63 }
0x10bd   :  { %v1039_v2 = vrot.slane %v1038_v10, 1 }
0x10be   :  { %v1122_v3 = vrot.slane %v1121_v11, 1 }
0x10bf   :  { %v1040_v7 = vadd.f32 %v1039_v2, %v1038_v10 }
0x10c0   :  { %v1123_v8 = vadd.f32 %v1122_v3, %v1121_v11 }
0x10c1   :  { %1327 = vpush %v1040_v7 }
0x10c2   :  { %1329 = vpush %v1123_v8 }
0x10f2   :  { %s1328_s8 = spop %1327 }
0x10f3   :  { %v1042_v12 = vstv %s1328_s8  ;;  %s1330_s20 = spop %1329 }
0x10f4   :  { %v1125_v0 = vstv %s1330_s20 }
0x10f5   :  { %v1126_v1 = vadd.f32 %v1125_v0, %v1042_v12 }
0x10f7   :  { %1447 = vrcp.f32 %v1126_v1 }
0x10fd   :  { %v1448_v4 = vpop.eup %1447 }
0x10fe   :  { %v1128_v5 = vmul.f32 %v1448_v4, %v1031_v55  ;;  %v1188_v14 = vmul.f32 %v1448_v4, %v1114_v56 }
0x1100   :  { %1129 = vxpose.xlu2.b32.start.end [1/1] (short) (narrow) %v1128_v5, 8 }
0x1108   :  { %1189 = vxpose.xlu2.b32.start.end [1/1] (short) (narrow) %v1188_v14, 8 }
0x1199   :  { %v1145_v15 = vpop.trf.xlu2 }
0x119a   :  { %1325 = vmatmul.msk.f32.vlgmr.msra.gmra.mxu2 %vm1162_vm5, %v1145_v15 }
0x11a1   :  { %v1205_v16 = vpop.trf.xlu2 }
0x11a2   :  { %1326 = vmatmul.msk.f32.vlgmr.msra.gmra.mxu3 %vm1162_vm5, %v1205_v16 }
0x121d   :  { %v1183_v17 = vpop.f32.mrf.mxu2 }
0x121e   :  { %1187 = vst.msk [vmem:[#allocation2] sm:$0xf] %vm1186_vm13, %v1183_v17 }
0x1225   :  { %v1242_v18 = vpop.f32.mrf.mxu3 }
0x1226   :  { %1246 = vst.msk [vmem:[#allocation2 + $0x4] sm:$0xf] %vm1186_vm13, %v1242_v18 }
0x1227   :  { %1263 = dma.vmem_to_hbm [thread:$0]  %s1256_s22, 128, %s1258_s24, [#allocation3], %s1479_s17, %s1479_s17, %s1481_s3  }
0x1228   :  { %1473 = dma.done.wait [#allocation3], 128  }
0x1229   :  { %1474 = vsyncadd [#allocation3], 4294967168 }
0x122a   :  { %1272 = vsyncpa [#allocation3], 1 }

</bundles_post_ra>
